<compile_context>
chip_gen: v7x
topology: tpu7x:2x2x1
jax: 0.10.0
libtpu: 0.0.40
codegen_flags: <defaults>
</compile_context>

<pallas_src>
import jax
import jax.numpy as jnp
from jax.experimental import pallas as pl
from jax.experimental.pallas import tpu as pltpu

SELU_ALPHA = 1.6732632423543772848170429916717
SELU_SCALE = 1.0507009873554804934193349852946

# Static layer config (matches the PyTorch module).
_CONV_CFG = (
    dict(kh=3, kw=3, pad=(0, 0)),  # Conv2d(3, 16, 3x3)
    dict(kh=5, kw=5, pad=(2, 2)),  # Conv2d(16, 32, 5x5, padding=2)
    dict(kh=3, kw=3, pad=(2, 2)),  # Conv2d(32, 64, 3x3, padding=2)
)
_CONV_TN = 256   # lane tile over the spatial (B*Ho*Wo) dim
_FC_TK = 2048    # K tile for the classifier head


def _round_up(x, m):
    return -(-x // m) * m


# ---------------------------------------------------------------------------
# Pallas kernel 1: conv GEMM (single K step) + bias + SELU, transposed layout.
#   w_ref: (Cout, Kp) bf16   p_ref: (Kp, tn) bf16   b_ref: (Cout, 1) f32
#   o_ref: (Cout, tn) bf16
# ---------------------------------------------------------------------------
def _conv_mm_selu_kernel(w_ref, p_ref, b_ref, o_ref):
    acc = jnp.dot(w_ref[...], p_ref[...], preferred_element_type=jnp.float32)
    y = acc + b_ref[...]
    # SELU(x) = scale * (x if x > 0 else alpha * (exp(x) - 1)), computed in f32.
    y = SELU_SCALE * jnp.where(
        y > 0.0, y, SELU_ALPHA * (jnp.exp(jnp.minimum(y, 0.0)) - 1.0)
    )
    o_ref[...] = y.astype(o_ref.dtype)


# ---------------------------------------------------------------------------
# Pallas kernel 2: classifier head, K-tiled matmul accumulating into the
# resident output block (full-dim M/N blocks, no padding of tiny dims).
#   x_ref: (M, tk) bf16   w_ref: (tk, N) bf16   b_ref: (1, N) f32
#   o_ref: (M, N) f32
# ---------------------------------------------------------------------------
def _fc_kernel(x_ref, w_ref, b_ref, o_ref):
    @pl.when(pl.program_id(0) == 0)
    def _():
        o_ref[...] = jnp.broadcast_to(b_ref[...], o_ref.shape).astype(o_ref.dtype)

    o_ref[...] += jnp.dot(x_ref[...], w_ref[...], preferred_element_type=jnp.float32)


# ---------------------------------------------------------------------------
# Conv2d + SELU (stride 1) via transposed im2col + fused Pallas GEMM.
# x_cbhw: (Cin, B, H, W) bf16 -> returns (Cout, B, Ho, Wo) bf16.
# ---------------------------------------------------------------------------
def conv_selu_t(x_cbhw, w_mat, b_col, kh, kw, pad):
    Cin, B, H, W = x_cbhw.shape
    Cout, Kp = w_mat.shape
    ph, pw = pad
    xp = jnp.pad(x_cbhw, ((0, 0), (0, 0), (ph, ph), (pw, pw)))
    Ho = H + 2 * ph - kh + 1
    Wo = W + 2 * pw - kw + 1
    K = kh * kw * Cin
    M = B * Ho * Wo

    # Transposed im2col: rows ordered (kh, kw, cin), columns (b, ho, wo).
    pt = jnp.stack(
        [xp[:, :, i:i + Ho, j:j + Wo] for i in range(kh) for j in range(kw)],
        axis=0,
    ).reshape(K, M)

    tn = _CONV_TN
    Mp = _round_up(M, tn)
    pt = jnp.pad(pt, ((0, Kp - K), (0, Mp - M))).astype(jnp.bfloat16)

    out = pl.pallas_call(
        _conv_mm_selu_kernel,
        out_shape=jax.ShapeDtypeStruct((Cout, Mp), jnp.bfloat16),
        grid_spec=pltpu.PrefetchScalarGridSpec(
            num_scalar_prefetch=0,
            grid=(Mp // tn,),
            in_specs=[
                pl.BlockSpec((Cout, Kp), lambda j: (0, 0)),  # whole weight, resident
                pl.BlockSpec((Kp, tn), lambda j: (0, j)),    # patch columns, lane-tiled
                pl.BlockSpec((Cout, 1), lambda j: (0, 0)),   # bias column
            ],
            out_specs=pl.BlockSpec((Cout, tn), lambda j: (0, j)),
        ),
        compiler_params=pltpu.CompilerParams(dimension_semantics=("parallel",)),
    )(w_mat, pt, b_col)

    return out[:, :M].reshape(Cout, B, Ho, Wo)


# ---------------------------------------------------------------------------
# Linear head: y = x @ W^T + b (W pre-transposed to (Kp, N) at prep time).
# ---------------------------------------------------------------------------
def fc_head(x_flat, w_kn, b_row):
    M, K = x_flat.shape
    Kp, N = w_kn.shape
    xp = jnp.pad(x_flat, ((0, 0), (0, Kp - K))).astype(jnp.bfloat16)

    return pl.pallas_call(
        _fc_kernel,
        out_shape=jax.ShapeDtypeStruct((M, N), jnp.float32),
        grid_spec=pltpu.PrefetchScalarGridSpec(
            num_scalar_prefetch=0,
            grid=(Kp // _FC_TK,),
            in_specs=[
                pl.BlockSpec((M, _FC_TK), lambda k: (0, k)),
                pl.BlockSpec((_FC_TK, N), lambda k: (k, 0)),
                pl.BlockSpec((1, N), lambda k: (0, 0)),
            ],
            out_specs=pl.BlockSpec((M, N), lambda k: (0, 0)),
        ),
        compiler_params=pltpu.CompilerParams(dimension_semantics=("arbitrary",)),
    )(xp, w_kn, b_row)


# ---------------------------------------------------------------------------
# Full forward (PyTorch semantics): NCHW input -> logits (B, num_classes).
# ---------------------------------------------------------------------------
def cnn_forward(x_nchw, prep):
    # (B, C, H, W) -> channel-major (C, B, H, W), bf16 activations.
    x = jnp.transpose(x_nchw, (1, 0, 2, 3)).astype(jnp.bfloat16)
    for cfg, layer in zip(_CONV_CFG, prep["convs"]):
        x = conv_selu_t(x, layer["w"], layer["b"], cfg["kh"], cfg["kw"], cfg["pad"])
    # nn.Flatten on NCHW: (C, B, H, W) -> (B, C, H, W) -> (B, C*H*W).
    C, B, H, W = x.shape
    x_flat = jnp.transpose(x, (1, 0, 2, 3)).reshape(B, C * H * W)
    return fc_head(x_flat, prep["fc_w"], prep["fc_b"])


# ---------------------------------------------------------------------------
# Parameters (PyTorch layout) and one-time kernel-ready preparation.
# ---------------------------------------------------------------------------
def init_params(key, num_classes, flat_dim):
    ks = jax.random.split(key, 8)
    s = 0.05
    return {
        "w1": s * jax.random.normal(ks[0], (16, 3, 3, 3), jnp.float32),
        "b1": s * jax.random.normal(ks[1], (16,), jnp.float32),
        "w2": s * jax.random.normal(ks[2], (32, 16, 5, 5), jnp.float32),
        "b2": s * jax.random.normal(ks[3], (32,), jnp.float32),
        "w3": s * jax.random.normal(ks[4], (64, 32, 3, 3), jnp.float32),
        "b3": s * jax.random.normal(ks[5], (64,), jnp.float32),
        # PyTorch Linear weight layout: (num_classes, flat_dim).
        "w_fc": s * jax.random.normal(ks[6], (num_classes, flat_dim), jnp.float32),
        "b_fc": s * jax.random.normal(ks[7], (num_classes,), jnp.float32),
    }


def prepare_params(params):
    """One-time prep: reshape/transpose/pad/cast weights for the kernels."""

    def prep_conv(w_oihw, b):
        Cout, Cin, KH, KW = w_oihw.shape
        K = KH * KW * Cin
        Kp = _round_up(K, 16)  # bf16 sublane packing
        # K ordered (kh, kw, cin) to match the patch rows.
        w_mat = jnp.transpose(w_oihw, (0, 2, 3, 1)).reshape(Cout, K)
        w_mat = jnp.pad(w_mat, ((0, 0), (0, Kp - K))).astype(jnp.bfloat16)
        return {"w": w_mat, "b": b.reshape(Cout, 1).astype(jnp.float32)}

    N, K = params["w_fc"].shape
    Kp = _round_up(K, _FC_TK)
    fc_w = jnp.pad(params["w_fc"].T, ((0, Kp - K), (0, 0))).astype(jnp.bfloat16)

    return {
        "convs": (
            prep_conv(params["w1"], params["b1"]),
            prep_conv(params["w2"], params["b2"]),
            prep_conv(params["w3"], params["b3"]),
        ),
        "fc_w": fc_w,
        "fc_b": params["b_fc"].reshape(1, N).astype(jnp.float32),
    }


if __name__ == "__main__":
    # Small shapes consistent with the module: B=2, Cin=3, 16x16 images.
    # (The reference hard-codes Linear(5721664, ...), implying ~299x299 inputs;
    #  here the Linear in-features follow from the small spatial size:
    #  conv1 (no pad) 16->14, conv2 (pad 2) 14->14, conv3 (pad 2) 14->16,
    #  so flat_dim = 64 * 16 * 16 = 16384.)
    B, Cin, H, W = 2, 3, 16, 16
    num_classes = 10
    flat_dim = 64 * 16 * 16

    key = jax.random.PRNGKey(0)
    k_x, k_p = jax.random.split(key)
    x = jax.random.normal(k_x, (B, Cin, H, W), jnp.float32)
    params = init_params(k_p, num_classes, flat_dim)
    prep = jax.tree_util.tree_map(jax.block_until_ready, prepare_params(params))

    out = jax.jit(cnn_forward)(x, prep)
    out = jax.block_until_ready(out)
    assert out.shape == (B, num_classes), out.shape
    assert jnp.all(jnp.isfinite(out))
    print("KERNEL_OK")
</pallas_src>

<mosaic_0001>
module attributes {stable_mosaic.version = 11 : i64} {
  func.func @_conv_mm_selu_kernel(%arg0: i32, %arg1: memref<16x32xbf16, #tpu.memory_space<vmem>>, %arg2: memref<32x256xbf16, #tpu.memory_space<vmem>>, %arg3: memref<16x1xf32, #tpu.memory_space<vmem>>, %arg4: memref<16x256xbf16, #tpu.memory_space<vmem>>) attributes {dimension_semantics = [#tpu.dimension_semantics<parallel>], iteration_bounds = array<i64: 2>, scalar_prefetch = 0 : i64, scratch_operands = 0 : i64, tpu.core_type = #tpu.core_type<tc>, window_params = [{pipeline_mode = #tpu.pipeline_mode<synchronous>, transform_indices = @transform_0, window_bounds = array<i64: 16, 32>}, {transform_indices = @transform_1, window_bounds = array<i64: 32, 256>}, {pipeline_mode = #tpu.pipeline_mode<synchronous>, transform_indices = @transform_2, window_bounds = array<i64: 16, 1>}, {transform_indices = @transform_3, window_bounds = array<i64: 16, 256>}]} {
    %c0 = arith.constant 0 : index
    %c0_0 = arith.constant 0 : index
    %0 = vector.load %arg1[%c0, %c0_0] : memref<16x32xbf16, #tpu.memory_space<vmem>>, vector<16x32xbf16>
    %c0_1 = arith.constant 0 : index
    %c0_2 = arith.constant 0 : index
    %1 = vector.load %arg2[%c0_1, %c0_2] : memref<32x256xbf16, #tpu.memory_space<vmem>>, vector<32x256xbf16>
    %cst = arith.constant dense<0.000000e+00> : vector<16x256xf32>
    %2 = tpu.matmul %0, %1, %cst {dimension_numbers = #tpu.dot_dimension_numbers<[1], [0], [0], [1], [0, 0, 1, 1], [], []>} : vector<16x32xbf16>, vector<32x256xbf16>, vector<16x256xf32> -> vector<16x256xf32>
    %c0_3 = arith.constant 0 : index
    %c0_4 = arith.constant 0 : index
    %3 = vector.load %arg3[%c0_3, %c0_4] : memref<16x1xf32, #tpu.memory_space<vmem>>, vector<16x1xf32>
    %4 = vector.broadcast %3 : vector<16x1xf32> to vector<16x256xf32>
    %5 = arith.addf %2, %4 : vector<16x256xf32>
    %cst_5 = arith.constant 0.000000e+00 : f32
    %6 = vector.broadcast %cst_5 : f32 to vector<16x256xf32>
    %7 = arith.cmpf ogt, %5, %6 : vector<16x256xf32>
    %cst_6 = arith.constant 0.000000e+00 : f32
    %8 = vector.broadcast %cst_6 : f32 to vector<16x256xf32>
    %9 = arith.minimumf %5, %8 : vector<16x256xf32>
    %10 = math.exp %9 : vector<16x256xf32>
    %cst_7 = arith.constant 1.000000e+00 : f32
    %11 = vector.broadcast %cst_7 : f32 to vector<16x256xf32>
    %12 = arith.subf %10, %11 : vector<16x256xf32>
    %cst_8 = arith.constant 1.67326319 : f32
    %13 = vector.broadcast %cst_8 : f32 to vector<16x256xf32>
    %14 = arith.mulf %13, %12 : vector<16x256xf32>
    %15 = arith.select %7, %5, %14 : vector<16x256xi1>, vector<16x256xf32>
    %cst_9 = arith.constant 1.05070102 : f32
    %16 = vector.broadcast %cst_9 : f32 to vector<16x256xf32>
    %17 = arith.mulf %16, %15 : vector<16x256xf32>
    %18 = arith.truncf %17 : vector<16x256xf32> to vector<16x256xbf16>
    %c0_10 = arith.constant 0 : index
    %c0_11 = arith.constant 0 : index
    %19 = vector.load %arg4[%c0_10, %c0_11] : memref<16x256xbf16, #tpu.memory_space<vmem>>, vector<16x256xbf16>
    tpu.vector_store %arg4[%c0_10, %c0_11], %18 {strides = array<i32>} : memref<16x256xbf16, #tpu.memory_space<vmem>>, vector<16x256xbf16>,
    return
  }
  func.func @transform_0(%arg0: i32) -> (i32, i32) {
    %c0_i32 = arith.constant 0 : i32
    %c0_i32_0 = arith.constant 0 : i32
    %c0_i32_1 = arith.constant 0 : i32
    return %c0_i32, %c0_i32_0 : i32, i32
  }
  func.func @transform_1(%arg0: i32) -> (i32, i32) {
    %c0_i32 = arith.constant 0 : i32
    %c0_i32_0 = arith.constant 0 : i32
    return %c0_i32, %arg0 : i32, i32
  }
  func.func @transform_2(%arg0: i32) -> (i32, i32) {
    %c0_i32 = arith.constant 0 : i32
    %c0_i32_0 = arith.constant 0 : i32
    %c0_i32_1 = arith.constant 0 : i32
    return %c0_i32, %c0_i32_0 : i32, i32
  }
  func.func @transform_3(%arg0: i32) -> (i32, i32) {
    %c0_i32 = arith.constant 0 : i32
    %c0_i32_0 = arith.constant 0 : i32
    return %c0_i32, %arg0 : i32, i32
  }
}

module attributes {stable_mosaic.version = 11 : i64} {
  func.func @_conv_mm_selu_kernel(%arg0: i32, %arg1: memref<32x400xbf16, #tpu.memory_space<vmem>>, %arg2: memref<400x256xbf16, #tpu.memory_space<vmem>>, %arg3: memref<32x1xf32, #tpu.memory_space<vmem>>, %arg4: memref<32x256xbf16, #tpu.memory_space<vmem>>) attributes {dimension_semantics = [#tpu.dimension_semantics<parallel>], iteration_bounds = array<i64: 2>, scalar_prefetch = 0 : i64, scratch_operands = 0 : i64, tpu.core_type = #tpu.core_type<tc>, window_params = [{pipeline_mode = #tpu.pipeline_mode<synchronous>, transform_indices = @transform_0, window_bounds = array<i64: 32, 400>}, {transform_indices = @transform_1, window_bounds = array<i64: 400, 256>}, {pipeline_mode = #tpu.pipeline_mode<synchronous>, transform_indices = @transform_2, window_bounds = array<i64: 32, 1>}, {transform_indices = @transform_3, window_bounds = array<i64: 32, 256>}]} {
    %c0 = arith.constant 0 : index
    %c0_0 = arith.constant 0 : index
    %0 = vector.load %arg1[%c0, %c0_0] : memref<32x400xbf16, #tpu.memory_space<vmem>>, vector<32x400xbf16>
    %c0_1 = arith.constant 0 : index
    %c0_2 = arith.constant 0 : index
    %1 = vector.load %arg2[%c0_1, %c0_2] : memref<400x256xbf16, #tpu.memory_space<vmem>>, vector<400x256xbf16>
    %cst = arith.constant dense<0.000000e+00> : vector<32x256xf32>
    %2 = tpu.matmul %0, %1, %cst {dimension_numbers = #tpu.dot_dimension_numbers<[1], [0], [0], [1], [0, 0, 1, 1], [], []>} : vector<32x400xbf16>, vector<400x256xbf16>, vector<32x256xf32> -> vector<32x256xf32>
    %c0_3 = arith.constant 0 : index
    %c0_4 = arith.constant 0 : index
    %3 = vector.load %arg3[%c0_3, %c0_4] : memref<32x1xf32, #tpu.memory_space<vmem>>, vector<32x1xf32>
    %4 = vector.broadcast %3 : vector<32x1xf32> to vector<32x256xf32>
    %5 = arith.addf %2, %4 : vector<32x256xf32>
    %cst_5 = arith.constant 0.000000e+00 : f32
    %6 = vector.broadcast %cst_5 : f32 to vector<32x256xf32>
    %7 = arith.cmpf ogt, %5, %6 : vector<32x256xf32>
    %cst_6 = arith.constant 0.000000e+00 : f32
    %8 = vector.broadcast %cst_6 : f32 to vector<32x256xf32>
    %9 = arith.minimumf %5, %8 : vector<32x256xf32>
    %10 = math.exp %9 : vector<32x256xf32>
    %cst_7 = arith.constant 1.000000e+00 : f32
    %11 = vector.broadcast %cst_7 : f32 to vector<32x256xf32>
    %12 = arith.subf %10, %11 : vector<32x256xf32>
    %cst_8 = arith.constant 1.67326319 : f32
    %13 = vector.broadcast %cst_8 : f32 to vector<32x256xf32>
    %14 = arith.mulf %13, %12 : vector<32x256xf32>
    %15 = arith.select %7, %5, %14 : vector<32x256xi1>, vector<32x256xf32>
    %cst_9 = arith.constant 1.05070102 : f32
    %16 = vector.broadcast %cst_9 : f32 to vector<32x256xf32>
    %17 = arith.mulf %16, %15 : vector<32x256xf32>
    %18 = arith.truncf %17 : vector<32x256xf32> to vector<32x256xbf16>
    %c0_10 = arith.constant 0 : index
    %c0_11 = arith.constant 0 : index
    %19 = vector.load %arg4[%c0_10, %c0_11] : memref<32x256xbf16, #tpu.memory_space<vmem>>, vector<32x256xbf16>
    tpu.vector_store %arg4[%c0_10, %c0_11], %18 {strides = array<i32>} : memref<32x256xbf16, #tpu.memory_space<vmem>>, vector<32x256xbf16>,
    return
  }
  func.func @transform_0(%arg0: i32) -> (i32, i32) {
    %c0_i32 = arith.constant 0 : i32
    %c0_i32_0 = arith.constant 0 : i32
    %c0_i32_1 = arith.constant 0 : i32
    return %c0_i32, %c0_i32_0 : i32, i32
  }
  func.func @transform_1(%arg0: i32) -> (i32, i32) {
    %c0_i32 = arith.constant 0 : i32
    %c0_i32_0 = arith.constant 0 : i32
    return %c0_i32, %arg0 : i32, i32
  }
  func.func @transform_2(%arg0: i32) -> (i32, i32) {
    %c0_i32 = arith.constant 0 : i32
    %c0_i32_0 = arith.constant 0 : i32
    %c0_i32_1 = arith.constant 0 : i32
    return %c0_i32, %c0_i32_0 : i32, i32
  }
  func.func @transform_3(%arg0: i32) -> (i32, i32) {
    %c0_i32 = arith.constant 0 : i32
    %c0_i32_0 = arith.constant 0 : i32
    return %c0_i32, %arg0 : i32, i32
  }
}

module attributes {stable_mosaic.version = 11 : i64} {
  func.func @_conv_mm_selu_kernel(%arg0: i32, %arg1: memref<64x288xbf16, #tpu.memory_space<vmem>>, %arg2: memref<288x256xbf16, #tpu.memory_space<vmem>>, %arg3: memref<64x1xf32, #tpu.memory_space<vmem>>, %arg4: memref<64x256xbf16, #tpu.memory_space<vmem>>) attributes {dimension_semantics = [#tpu.dimension_semantics<parallel>], iteration_bounds = array<i64: 2>, scalar_prefetch = 0 : i64, scratch_operands = 0 : i64, tpu.core_type = #tpu.core_type<tc>, window_params = [{pipeline_mode = #tpu.pipeline_mode<synchronous>, transform_indices = @transform_0, window_bounds = array<i64: 64, 288>}, {transform_indices = @transform_1, window_bounds = array<i64: 288, 256>}, {pipeline_mode = #tpu.pipeline_mode<synchronous>, transform_indices = @transform_2, window_bounds = array<i64: 64, 1>}, {transform_indices = @transform_3, window_bounds = array<i64: 64, 256>}]} {
    %c0 = arith.constant 0 : index
    %c0_0 = arith.constant 0 : index
    %0 = vector.load %arg1[%c0, %c0_0] : memref<64x288xbf16, #tpu.memory_space<vmem>>, vector<64x288xbf16>
    %c0_1 = arith.constant 0 : index
    %c0_2 = arith.constant 0 : index
    %1 = vector.load %arg2[%c0_1, %c0_2] : memref<288x256xbf16, #tpu.memory_space<vmem>>, vector<288x256xbf16>
    %cst = arith.constant dense<0.000000e+00> : vector<64x256xf32>
    %2 = tpu.matmul %0, %1, %cst {dimension_numbers = #tpu.dot_dimension_numbers<[1], [0], [0], [1], [0, 0, 1, 1], [], []>} : vector<64x288xbf16>, vector<288x256xbf16>, vector<64x256xf32> -> vector<64x256xf32>
    %c0_3 = arith.constant 0 : index
    %c0_4 = arith.constant 0 : index
    %3 = vector.load %arg3[%c0_3, %c0_4] : memref<64x1xf32, #tpu.memory_space<vmem>>, vector<64x1xf32>
    %4 = vector.broadcast %3 : vector<64x1xf32> to vector<64x256xf32>
    %5 = arith.addf %2, %4 : vector<64x256xf32>
    %cst_5 = arith.constant 0.000000e+00 : f32
    %6 = vector.broadcast %cst_5 : f32 to vector<64x256xf32>
    %7 = arith.cmpf ogt, %5, %6 : vector<64x256xf32>
    %cst_6 = arith.constant 0.000000e+00 : f32
    %8 = vector.broadcast %cst_6 : f32 to vector<64x256xf32>
    %9 = arith.minimumf %5, %8 : vector<64x256xf32>
    %10 = math.exp %9 : vector<64x256xf32>
    %cst_7 = arith.constant 1.000000e+00 : f32
    %11 = vector.broadcast %cst_7 : f32 to vector<64x256xf32>
    %12 = arith.subf %10, %11 : vector<64x256xf32>
    %cst_8 = arith.constant 1.67326319 : f32
    %13 = vector.broadcast %cst_8 : f32 to vector<64x256xf32>
    %14 = arith.mulf %13, %12 : vector<64x256xf32>
    %15 = arith.select %7, %5, %14 : vector<64x256xi1>, vector<64x256xf32>
    %cst_9 = arith.constant 1.05070102 : f32
    %16 = vector.broadcast %cst_9 : f32 to vector<64x256xf32>
    %17 = arith.mulf %16, %15 : vector<64x256xf32>
    %18 = arith.truncf %17 : vector<64x256xf32> to vector<64x256xbf16>
    %c0_10 = arith.constant 0 : index
    %c0_11 = arith.constant 0 : index
    %19 = vector.load %arg4[%c0_10, %c0_11] : memref<64x256xbf16, #tpu.memory_space<vmem>>, vector<64x256xbf16>
    tpu.vector_store %arg4[%c0_10, %c0_11], %18 {strides = array<i32>} : memref<64x256xbf16, #tpu.memory_space<vmem>>, vector<64x256xbf16>,
    return
  }
  func.func @transform_0(%arg0: i32) -> (i32, i32) {
    %c0_i32 = arith.constant 0 : i32
    %c0_i32_0 = arith.constant 0 : i32
    %c0_i32_1 = arith.constant 0 : i32
    return %c0_i32, %c0_i32_0 : i32, i32
  }
  func.func @transform_1(%arg0: i32) -> (i32, i32) {
    %c0_i32 = arith.constant 0 : i32
    %c0_i32_0 = arith.constant 0 : i32
    return %c0_i32, %arg0 : i32, i32
  }
  func.func @transform_2(%arg0: i32) -> (i32, i32) {
    %c0_i32 = arith.constant 0 : i32
    %c0_i32_0 = arith.constant 0 : i32
    %c0_i32_1 = arith.constant 0 : i32
    return %c0_i32, %c0_i32_0 : i32, i32
  }
  func.func @transform_3(%arg0: i32) -> (i32, i32) {
    %c0_i32 = arith.constant 0 : i32
    %c0_i32_0 = arith.constant 0 : i32
    return %c0_i32, %arg0 : i32, i32
  }
}

module attributes {stable_mosaic.version = 11 : i64} {
  func.func @_fc_kernel(%arg0: i32, %arg1: memref<2x2048xbf16, #tpu.memory_space<vmem>>, %arg2: memref<2048x10xbf16, #tpu.memory_space<vmem>>, %arg3: memref<1x10xf32, #tpu.memory_space<vmem>>, %arg4: memref<2x10xf32, #tpu.memory_space<vmem>>) attributes {dimension_semantics = [#tpu.dimension_semantics<arbitrary>], iteration_bounds = array<i64: 8>, scalar_prefetch = 0 : i64, scratch_operands = 0 : i64, tpu.core_type = #tpu.core_type<tc>, window_params = [{transform_indices = @transform_0, window_bounds = array<i64: 2, 2048>}, {transform_indices = @transform_1, window_bounds = array<i64: 2048, 10>}, {pipeline_mode = #tpu.pipeline_mode<synchronous>, transform_indices = @transform_2, window_bounds = array<i64: 1, 10>}, {pipeline_mode = #tpu.pipeline_mode<synchronous>, transform_indices = @transform_3, window_bounds = array<i64: 2, 10>}]} {
    %c0_i32 = arith.constant 0 : i32
    %0 = arith.cmpi eq, %arg0, %c0_i32 : i32
    %1 = arith.extui %0 : i1 to i32
    %c0_i32_0 = arith.constant 0 : i32
    %2 = arith.cmpi ne, %1, %c0_i32_0 : i32
    scf.if %2 {
      %c0_8 = arith.constant 0 : index
      %c0_9 = arith.constant 0 : index
      %9 = vector.load %arg3[%c0_8, %c0_9] : memref<1x10xf32, #tpu.memory_space<vmem>>, vector<1x10xf32>
      %10 = vector.shape_cast %9 : vector<1x10xf32> to vector<1x10xf32>
      %11 = vector.broadcast %10 : vector<1x10xf32> to vector<2x10xf32>
      %c0_10 = arith.constant 0 : index
      %c0_11 = arith.constant 0 : index
      %12 = vector.load %arg4[%c0_10, %c0_11] : memref<2x10xf32, #tpu.memory_space<vmem>>, vector<2x10xf32>
      tpu.vector_store %arg4[%c0_10, %c0_11], %11 {strides = array<i32>} : memref<2x10xf32, #tpu.memory_space<vmem>>, vector<2x10xf32>,
    } else {
    }
    %c0 = arith.constant 0 : index
    %c0_1 = arith.constant 0 : index
    %3 = vector.load %arg4[%c0, %c0_1] : memref<2x10xf32, #tpu.memory_space<vmem>>, vector<2x10xf32>
    %c0_2 = arith.constant 0 : index
    %c0_3 = arith.constant 0 : index
    %4 = vector.load %arg1[%c0_2, %c0_3] : memref<2x2048xbf16, #tpu.memory_space<vmem>>, vector<2x2048xbf16>
    %c0_4 = arith.constant 0 : index
    %c0_5 = arith.constant 0 : index
    %5 = vector.load %arg2[%c0_4, %c0_5] : memref<2048x10xbf16, #tpu.memory_space<vmem>>, vector<2048x10xbf16>
    %cst = arith.constant dense<0.000000e+00> : vector<2x10xf32>
    %6 = tpu.matmul %4, %5, %cst {dimension_numbers = #tpu.dot_dimension_numbers<[1], [0], [0], [1], [0, 0, 1, 1], [], []>} : vector<2x2048xbf16>, vector<2048x10xbf16>, vector<2x10xf32> -> vector<2x10xf32>
    %7 = arith.addf %3, %6 : vector<2x10xf32>
    %c0_6 = arith.constant 0 : index
    %c0_7 = arith.constant 0 : index
    %8 = vector.load %arg4[%c0_6, %c0_7] : memref<2x10xf32, #tpu.memory_space<vmem>>, vector<2x10xf32>
    tpu.vector_store %arg4[%c0_6, %c0_7], %7 {strides = array<i32>} : memref<2x10xf32, #tpu.memory_space<vmem>>, vector<2x10xf32>,
    return
  }
  func.func @transform_0(%arg0: i32) -> (i32, i32) {
    %c0_i32 = arith.constant 0 : i32
    %c0_i32_0 = arith.constant 0 : i32
    return %c0_i32, %arg0 : i32, i32
  }
  func.func @transform_1(%arg0: i32) -> (i32, i32) {
    %c0_i32 = arith.constant 0 : i32
    %c0_i32_0 = arith.constant 0 : i32
    return %arg0, %c0_i32 : i32, i32
  }
  func.func @transform_2(%arg0: i32) -> (i32, i32) {
    %c0_i32 = arith.constant 0 : i32
    %c0_i32_0 = arith.constant 0 : i32
    %c0_i32_1 = arith.constant 0 : i32
    return %c0_i32, %c0_i32_0 : i32, i32
  }
  func.func @transform_3(%arg0: i32) -> (i32, i32) {
    %c0_i32 = arith.constant 0 : i32
    %c0_i32_0 = arith.constant 0 : i32
    %c0_i32_1 = arith.constant 0 : i32
    return %c0_i32, %c0_i32_0 : i32, i32
  }
}

</mosaic_0001>

<bundles_post_ra>
// kernel: cnn_forward.4
= control target key start
LH: loop header
LB: loop body
LE: loop exit
PB: predicated region body
PF: predicated region fallthrough
CT: control target
= control target key end

     0   :  { %8 = vsyncpa [#allocation3], 0  ;;  %s647_s12 = smov 0   ;;  %s649_s13 = smov 0   ;;  %s758_s0 = inlined_call_operand.hbm [shape: bf16[16,32], index: 0, kind: input, shape index: {}]   ;;  %s759_s1 = inlined_call_operand.vmem [shape: bf16[32,512], index: 1, kind: input, shape index: {}]   ;;  %s760_s2 = inlined_call_operand.vmem [shape: f32[16,1], index: 2, kind: input, shape index: {}]   ;;  %s761_s3 = inlined_call_operand.vmem [shape: bf16[16,512], index: 3, kind: output, shape index: {}]  }
   0x1   :  { %s651_s14 = smov 0  }
   0x2 LB: > { %s663_s15 = sadd.s32 4294967295, %s621_s14   ;;  %s666_s16 = sadd.s32 1, %s621_s14   ;;  %s621_s14 = sphi %s651_s14, %s775_s14   ;;  %s617_s13 = sphi %s649_s13, %s774_s13   ;;  %s613_s12 = sphi %s647_s12, %s773_s12  }
   0x3   : > { %s39_s17 = ssub.s32 %s621_s14, %s666_s16  ;;  %s42_s18 = sadd.s32 1, %s617_s13 }
   0x4   : > { %p40_p0 = scmp.eq.s32.totalorder %s39_s17, 0  ;;  %p49_p1 = scmp.ne.s32.totalorder %s617_s13, %s613_s12 }
   0x5   : > { %p50_p2 = scmp.eq.s32.totalorder %s621_s14, 0  ;;  %p100_p3 = scmp.eq.s32.totalorder %s663_s15, 1 }
   0x6   : > { %s676_s19 = scalar_select %p40_p0, %s617_s13, %s42_s18  }
   0x7   : > { %p678_p4 = por %p50_p2, %p49_p1  ;;  %p682_p5 = por %p100_p3, %p49_p1 }
   0x8   : > { %p482_p6 = scmp.ge.s32.totalorder %s621_s14, 1  ;;  %p113_p7 = scmp.lt.s32.totalorder %s621_s14, 3 }
   0x9   : > { %s764_s20 = scalar_select %p678_p4, 1, 0 }
   0xa   : > { %s765_s21 = scalar_select %p682_p5, 1, 0 }
   0xb   : > { %p762_p8 = scmp.eq.s32.totalorder %s663_s15, 0  ;;  %p689_p9 = pnand %p482_p6, %p113_p7 }
   0xc   : > { %s623_s23 = smov [#allocation2]   ;;  %s567_s28 = scalar_lea.hbm %s758_s0, 128 }
   0xd   : > { %s766_s22 = scalar_select %p689_p9, 1, 0 }
   0xe   : > { %s125_s24 = sshll.u32 %s623_s23, 4  ;;  %p517_p10 = pneg %p689_p9  ;;  %s126_s24 = int_to_ptr.vmem [resolvable:$true] %s125_s24 }
   0xf   : > { %p568_p12 = scmp.ne.s32.totalorder %s758_s0, %s567_s28  ;;  %p574_p2 = scmp.lt.u32.totalorder %s567_s28, %s758_s0 }
  0x10   : > { %p697_p11 = pnand %p762_p8, %p517_p10 }
  0x12   : > { %p569_p13 = pneg %p697_p11 }
  0x14   : > { %p570_p0 = pnand %p569_p13, %p568_p12 }
  0x16   : > { %p571_p1 = pneg %p570_p0 }
  0x18   : > { %p576_p3 = pnand %p574_p2, %p571_p1 }
  0x1a   : > { %579 = shalt.err (!%p576_p3)
}
  0x1b   : > { %s580_s6 = scalar_lea.vmem %s126_s24, 128  ;;  %p588_p8 = scmp.lt.s32.totalorder %s126_s24, %s126_s24 }
  0x1c   : > { %p581_p6 = scmp.ne.s32.totalorder %s126_s24, %s580_s6  ;;  %p589_p5 = scmp.lt.s32.totalorder %s580_s6, %s580_s6 }
  0x1e   : > { %p583_p7 = pnand %p581_p6, %p569_p13  ;;  %p590_p9 = por %p589_p5, %p588_p8 }
  0x20   : > { %p584_p10 = pneg %p583_p7 }
  0x22   : > { %p591_p4 = pnand %p590_p9, %p584_p10 }
  0x24   : > { %594 = shalt.err (!%p591_p4)
}
  0x25   : > { %s624_s7 = smov 64   ;;  %s625_s8 = smov 4  }
  0x26   : > { %520 = dma.hbm_to_vmem [thread:$0]  (!%p697_p11), %s758_s0, 128, %s126_s24, [#allocation3], %s624_s7, %s624_s7, %s625_s8  }
  0x27   : > { %p484_p12 = scmp.ge.s32.totalorder %s621_s14, 2 }
  0x28   : > { %p768_p0 = scmp.ne.s32.totalorder (!%p484_p12), %s764_s20, 0 }
  0x29   : > { %138 = sbr.rel (%p484_p12) target bundleno = 55 (0x37), region = 24 }
  0x30   : > { %141 = sbr.rel (!%p768_p0) target bundleno = 55 (0x37), region = 28  ;;  %s143_s11 = sand.u32 (%p768_p0), 1, %s617_s13  }
  0x31   : > { %s509_s17 = sshll.u32 (%p768_p0), %s621_s14, 3  ;;  %s485_s18 = sshll.u32 (%p768_p0), %s143_s11, 5 }
  0x32   : > { %s148_s27 = scalar_lea.vmem (%p768_p0), %s759_s1, %s509_s17  ;;  %s145_s25 = scalar_lea.vmem (%p768_p0), [#allocation4], %s485_s18 }
  0x33   : > { %v182_v0 = vld [vmem:[%s148_s27] sm:$0xff] (%p768_p0)  ;;  %v184_v1 = vld [vmem:[%s148_s27 + $0x10] sm:$0xff] (%p768_p0) }
  0x34   : > { %v186_v2 = vld [vmem:[%s148_s27 + $0x20] sm:$0xff] (%p768_p0)  ;;  %183 = vst [vmem:[%s145_s25] sm:$0xff] (%p768_p0), %v182_v0  ;;  %185 = vst [vmem:[%s145_s25 + $0x8] sm:$0xff] (%p768_p0), %v184_v1  ;;  %v188_v3 = vld [vmem:[%s148_s27 + $0x30] sm:$0xff] (%p768_p0) }
  0x35   : > { %187 = vst [vmem:[%s145_s25 + $0x10] sm:$0xff] (%p768_p0), %v186_v2  ;;  %189 = vst [vmem:[%s145_s25 + $0x18] sm:$0xff] (%p768_p0), %v188_v3 }
  0x37 PF: > { %p769_p4 = scmp.ne.s32.totalorder %s766_s22, 0 }
  0x38   : > { %p770_p5 = scmp.eq.s32.totalorder (!%p769_p4), %s663_s15, 0 }
  0x39   : > { %198 = sbr.rel (%p769_p4) target bundleno = 327 (0x147), region = 66 }
  0x40   : > { %608 = dma.done.wait (%p770_p5), [#allocation3], 128   ;;  %p771_p8 = pmov %p770_p5 }
  0x41   : > { %s205_s14 = sand.u32 1, %s613_s12   ;;  %v626_v4 = vmov 0   ;;  %v236_v9 = vld [vmem:[%s760_s2] sm:$0xff]  ;;  %v237_v10 = vld [vmem:[%s760_s2 + $0x8] sm:$0xff]  ;;  %vm273_vm0 = vcmask 261120   ;;  %p772_p9 = scmp.ne.s32.totalorder %s765_s21, 0 }
  0x42   : > { %610 = vsyncadd (%p771_p8), [#allocation3], 4294967168  ;;  %s490_s20 = sshll.u32 %s205_s14, 5  ;;  %309 = vmatprep.mubr.bf16.mxu0 %v626_v4  ;;  %551 = vset.pattern.permute.xlu0 %v626_v4  ;;  %v558_v11 = vld [vmem:[#allocation2] sm:$0xff]   ;;  %s491_s4 = sshll.u32 %s205_s14, 4 }
  0x43   : > { %s207_s24 = scalar_lea.vmem [#allocation4], %s490_s20  ;;  %240 = vperm.xlu0 %551, %v236_v9   ;;  %s226_s5 = scalar_lea.vmem [#allocation5], %s491_s4 }
  0x44   : > { %v552_v5 = vld [vmem:[%s207_s24 + $0x4] ss:$8 sps:$4 sm:$0xff]   ;;  %v554_v6 = vld [vmem:[%s207_s24] ss:$8 sps:$4 sm:$0xff]   ;;  %v555_v7 = vld [vmem:[%s207_s24 + $0x14] ss:$8 sps:$4 sm:$0xff]  }
  0x45   : > { %277 = vmatprep.subr.bf16.mxu0 %v552_v5  ;;  %v557_v8 = vld [vmem:[%s207_s24 + $0x10] ss:$8 sps:$4 sm:$0xff]   ;;  %s512_s12 = sshll.u32 (%p772_p9), %s663_s15, 3 }
  0x46   : > { %278 = vmatpush1.bf16.msra.mxu0 %v554_v6  ;;  %s375_s8 = scalar_lea.vmem (%p772_p9), %s761_s3, %s512_s12 }
  0x47   : > { %279 = vmatprep.subr.bf16.mxu0 %v555_v7  ;;  %245 = vperm.xlu0 %551, %v237_v10  }
  0x4a   : > { %280 = vmatpush1.bf16.msra.mxu0 %v557_v8 }
  0x4d   : > { %497 = vmatmul.mubr.msk.bf16.vlgmr.msra.gmra.mrb[0].mxu0 %vm273_vm0, %v558_v11 }
  0xc2   : > { %v241_v12 = vpop.permute.xlu0 %240 }
  0xc6   : > { %v246_v16 = vpop.permute.xlu0 %245 }
 0x120   : > { %v311_v13 = vpop.f32.mrb[0].mxu0 }
 0x121   : > { %v312_v14 = vadd.f32 %v311_v13, %v241_v12  ;;  %v313_v15 = vpop.f32.mrb[1].mxu0 }
 0x122   : > { %v314_v17 = vadd.f32 %v313_v15, %v241_v12  ;;  %v315_v18 = vpop.f32.mrb[2].mxu0 }
 0x123   : > { %v324_v19 = vmin.f32 %v312_v14, 0.0  ;;  %v316_v20 = vadd.f32 %v315_v18, %v246_v16  ;;  %v317_v21 = vpop.f32.mrb[3].mxu0  ;;  %vm320_vm1 = vcmp.gt.f32.partialorder %v312_v14, 0.0 }
 0x124   : > { %v325_v22 = vmin.f32 %v314_v17, 0.0  ;;  %v318_v23 = vadd.f32 %v317_v21, %v246_v16  ;;  %vm321_vm2 = vcmp.gt.f32.partialorder %v314_v17, 0.0 }
 0x125   : > { %v328_v24 = vmul.f32 1.442695, %v324_v19  ;;  %v326_v25 = vmin.f32 %v316_v20, 0.0  ;;  %vm322_vm3 = vcmp.gt.f32.partialorder %v316_v20, 0.0 }
 0x126   : > { %v330_v26 = vmul.f32 1.442695, %v325_v22  ;;  %v327_v27 = vmin.f32 %v318_v23, 0.0  ;;  %vm323_vm4 = vcmp.gt.f32.partialorder %v318_v23, 0.0 }
 0x127   : > { %559 = vpow2.f32 %v328_v24  ;;  %v332_v28 = vmul.f32 1.442695, %v326_v25 }
 0x128   : > { %561 = vpow2.f32 %v330_v26  ;;  %v334_v29 = vmul.f32 1.442695, %v327_v27 }
 0x129   : > { %563 = vpow2.f32 %v332_v28 }
 0x12a   : > { %565 = vpow2.f32 %v334_v29 }
 0x131   : > { %v560_v30 = vpop.eup %559 }
 0x132   : > { %v562_v31 = vpop.eup %561  ;;  %v498_v32 = vadd.f32 -1.0, %v560_v30 }
 0x133   : > { %v564_v33 = vpop.eup %563  ;;  %v499_v34 = vadd.f32 -1.0, %v562_v31 }
 0x134   : > { %v566_v35 = vpop.eup %565  ;;  %v340_v36 = vmul.f32 1.6732632, %v498_v32  ;;  %v500_v37 = vadd.f32 -1.0, %v564_v33 }
 0x135   : > { %v341_v38 = vmul.f32 1.6732632, %v499_v34  ;;  %v501_v39 = vadd.f32 -1.0, %v566_v35 }
 0x136   : > { %v344_v40 = vsel %vm320_vm1, %v312_v14, %v340_v36  ;;  %v342_v41 = vmul.f32 1.6732632, %v500_v37 }
 0x137   : > { %v348_v42 = vmul.f32 1.050701, %v344_v40  ;;  %v345_v43 = vsel %vm321_vm2, %v314_v17, %v341_v38  ;;  %v343_v44 = vmul.f32 1.6732632, %v501_v39 }
 0x138   : > { %v349_v45 = vmul.f32 1.050701, %v345_v43  ;;  %v346_v46 = vsel %vm322_vm3, %v316_v20, %v342_v41  ;;  %372 = sbr.rel (!%p772_p9) target bundleno = 327 (0x147), region = 78 }
 0x139   : > { %v350_v47 = vmul.f32 1.050701, %v346_v46  ;;  %v347_v48 = vsel %vm323_vm4, %v318_v23, %v343_v44 }
 0x13a   : > { %v510_v49 = vpack.c.bf16 %v349_v45, %v348_v42  ;;  %v351_v50 = vmul.f32 1.050701, %v347_v48 }
 0x13c   : > { %364 = vst [vmem:[%s226_s5] sm:$0xff] %v510_v49  ;;  %v511_v51 = vpack.c.bf16 %v351_v50, %v350_v47 }
 0x13e   : > { %365 = vst [vmem:[%s226_s5 + $0x8] sm:$0xff] %v511_v51 }
 0x143   : > { %v405_v52 = vld [vmem:[%s226_s5] sm:$0xff] }
 0x144   : > { %406 = vst [vmem:[%s375_s8] sm:$0xff] %v405_v52 }
 0x145   : > { %v407_v53 = vld [vmem:[%s226_s5 + $0x8] sm:$0xff] }
 0x146   : > { %408 = vst [vmem:[%s375_s8 + $0x10] sm:$0xff] %v407_v53 }
 0x147 PF: > { %p11_p11 = scmp.ge.s32.totalorder %s666_s16, 4   ;;  %s773_s12 = smov %s617_s13 }
 0x148   : > { %s774_s13 = smov %s676_s19  ;;  %s775_s14 = smov %s666_s16 }
 0x149   :  { %13 = sbr.rel (!%p11_p11) target bundleno = 2 (0x2), region = 148 }
 0x150   :  { %424 = vsyncpa [#allocation3], 1 }
 0x151   :  { %426 = vsyncpa [#allocation3 + $0x1], 1 }

// kernel: cnn_forward.5
= control target key start
LH: loop header
LB: loop body
LE: loop exit
PB: predicated region body
PF: predicated region fallthrough
CT: control target
= control target key end

     0   :  { %s1368_s12 = smov 0   ;;  %s1370_s13 = smov 0   ;;  %s1646_s0 = inlined_call_operand.vmem [shape: bf16[32,400], index: 0, kind: input, shape index: {}]   ;;  %s1647_s1 = inlined_call_operand.vmem [shape: bf16[400,512], index: 1, kind: input, shape index: {}]   ;;  %s1648_s2 = inlined_call_operand.vmem [shape: f32[32,1], index: 2, kind: input, shape index: {}]   ;;  %s1649_s3 = inlined_call_operand.vmem [shape: bf16[32,512], index: 3, kind: output, shape index: {}]  }
   0x1   :  { %s1372_s14 = smov 0  }
   0x2 LB: > { %s1084_s15 = sadd.s32 4294967295, %s1345_s14   ;;  %s1385_s16 = sadd.s32 1, %s1345_s14   ;;  %s1345_s14 = sphi %s1372_s14, %s1653_s14   ;;  %s1341_s13 = sphi %s1370_s13, %s1652_s13   ;;  %s1337_s12 = sphi %s1368_s12, %s1651_s12  }
   0x3   : > { %s38_s17 = ssub.s32 %s1345_s14, %s1385_s16  ;;  %s41_s18 = sadd.s32 1, %s1341_s13 }
   0x4   : > { %p39_p0 = scmp.eq.s32.totalorder %s38_s17, 0  ;;  %p48_p1 = scmp.ne.s32.totalorder %s1341_s13, %s1337_s12 }
   0x5   : > { %p49_p2 = scmp.eq.s32.totalorder %s1345_s14, 0  ;;  %p99_p3 = scmp.eq.s32.totalorder %s1084_s15, 1 }
   0x6   : > { %s1396_s19 = scalar_select %p39_p0, %s1341_s13, %s41_s18  }
   0x7   : > { %p50_p4 = por %p49_p2, %p48_p1  ;;  %p1398_p5 = por %p99_p3, %p48_p1 }
   0x8   : > { %p1087_p6 = scmp.ge.s32.totalorder %s1345_s14, 2 }
   0xa   : > { %127 = sbr.rel (%p1087_p6) target bundleno = 46 (0x2e), region = 24 }
  0x11   : > { %130 = sbr.rel (!%p50_p4) target bundleno = 46 (0x2e), region = 28  ;;  %s132_s21 = sand.u32 (%p50_p4), 1, %s1341_s13  }
  0x12   : > { %s1169_s22 = sshll.u32 (%p50_p4), %s1345_s14, 3  ;;  %s1191_s23 = smul.u32 (%p50_p4), 400, %s132_s21 }
  0x13   : > { %s1408_s26 = scalar_lea.vmem (%p50_p4), %s1647_s1, %s1169_s22 }
  0x14   : > { %v263_v0 = vld [vmem:[%s1408_s26] sm:$0xff] (%p50_p4)  ;;  %v265_v1 = vld [vmem:[%s1408_s26 + $0x10] sm:$0xff] (%p50_p4)  ;;  %s1416_s27 = scalar_lea.vmem (%p50_p4), [#allocation2], %s1191_s23 }
  0x15   : > { %v267_v2 = vld [vmem:[%s1408_s26 + $0x20] sm:$0xff] (%p50_p4)  ;;  %v269_v3 = vld [vmem:[%s1408_s26 + $0x30] sm:$0xff] (%p50_p4)  ;;  %264 = vst [vmem:[%s1416_s27] sm:$0xff] (%p50_p4), %v263_v0  ;;  %266 = vst [vmem:[%s1416_s27 + $0x8] sm:$0xff] (%p50_p4), %v265_v1 }
  0x16   : > { %v271_v4 = vld [vmem:[%s1408_s26 + $0x40] sm:$0xff] (%p50_p4)  ;;  %v273_v5 = vld [vmem:[%s1408_s26 + $0x50] sm:$0xff] (%p50_p4)  ;;  %268 = vst [vmem:[%s1416_s27 + $0x10] sm:$0xff] (%p50_p4), %v267_v2  ;;  %270 = vst [vmem:[%s1416_s27 + $0x18] sm:$0xff] (%p50_p4), %v269_v3 }
  0x17   : > { %272 = vst [vmem:[%s1416_s27 + $0x20] sm:$0xff] (%p50_p4), %v271_v4  ;;  %274 = vst [vmem:[%s1416_s27 + $0x28] sm:$0xff] (%p50_p4), %v273_v5  ;;  %v275_v6 = vld [vmem:[%s1408_s26 + $0x60] sm:$0xff] (%p50_p4)  ;;  %v277_v7 = vld [vmem:[%s1408_s26 + $0x70] sm:$0xff] (%p50_p4) }
  0x18   : > { %v279_v8 = vld [vmem:[%s1408_s26 + $0x80] sm:$0xff]  ;;  %276 = vst [vmem:[%s1416_s27 + $0x30] sm:$0xff] %v275_v6  ;;  %278 = vst [vmem:[%s1416_s27 + $0x38] sm:$0xff] %v277_v7  ;;  %v281_v9 = vld [vmem:[%s1408_s26 + $0x90] sm:$0xff] }
  0x19   : > { %280 = vst [vmem:[%s1416_s27 + $0x40] sm:$0xff] %v279_v8  ;;  %v283_v10 = vld [vmem:[%s1408_s26 + $0xa0] sm:$0xff]  ;;  %v285_v11 = vld [vmem:[%s1408_s26 + $0xb0] sm:$0xff]  ;;  %282 = vst [vmem:[%s1416_s27 + $0x48] sm:$0xff] %v281_v9 }
  0x1a   : > { %284 = vst [vmem:[%s1416_s27 + $0x50] sm:$0xff] %v283_v10  ;;  %286 = vst [vmem:[%s1416_s27 + $0x58] sm:$0xff] %v285_v11  ;;  %v287_v12 = vld [vmem:[%s1408_s26 + $0xc0] sm:$0xff]  ;;  %v289_v13 = vld [vmem:[%s1408_s26 + $0xd0] sm:$0xff] }
  0x1b   : > { %v291_v14 = vld [vmem:[%s1408_s26 + $0xe0] sm:$0xff]  ;;  %288 = vst [vmem:[%s1416_s27 + $0x60] sm:$0xff] %v287_v12  ;;  %290 = vst [vmem:[%s1416_s27 + $0x68] sm:$0xff] %v289_v13  ;;  %v293_v15 = vld [vmem:[%s1408_s26 + $0xf0] sm:$0xff] }
  0x1c   : > { %292 = vst [vmem:[%s1416_s27 + $0x70] sm:$0xff] %v291_v14  ;;  %v295_v16 = vld [vmem:[%s1408_s26 + $0x100] sm:$0xff]  ;;  %v297_v17 = vld [vmem:[%s1408_s26 + $0x110] sm:$0xff]  ;;  %294 = vst [vmem:[%s1416_s27 + $0x78] sm:$0xff] %v293_v15 }
  0x1d   : > { %296 = vst [vmem:[%s1416_s27 + $0x80] sm:$0xff] %v295_v16  ;;  %298 = vst [vmem:[%s1416_s27 + $0x88] sm:$0xff] %v297_v17  ;;  %v299_v18 = vld [vmem:[%s1408_s26 + $0x120] sm:$0xff]  ;;  %v301_v19 = vld [vmem:[%s1408_s26 + $0x130] sm:$0xff] }
  0x1e   : > { %v303_v20 = vld [vmem:[%s1408_s26 + $0x140] sm:$0xff]  ;;  %300 = vst [vmem:[%s1416_s27 + $0x90] sm:$0xff] %v299_v18  ;;  %302 = vst [vmem:[%s1416_s27 + $0x98] sm:$0xff] %v301_v19  ;;  %v305_v21 = vld [vmem:[%s1408_s26 + $0x150] sm:$0xff] }
  0x1f   : > { %304 = vst [vmem:[%s1416_s27 + $0xa0] sm:$0xff] %v303_v20  ;;  %v307_v22 = vld [vmem:[%s1408_s26 + $0x160] sm:$0xff]  ;;  %v309_v23 = vld [vmem:[%s1408_s26 + $0x170] sm:$0xff]  ;;  %306 = vst [vmem:[%s1416_s27 + $0xa8] sm:$0xff] %v305_v21 }
  0x20   : > { %308 = vst [vmem:[%s1416_s27 + $0xb0] sm:$0xff] %v307_v22  ;;  %310 = vst [vmem:[%s1416_s27 + $0xb8] sm:$0xff] %v309_v23  ;;  %v311_v24 = vld [vmem:[%s1408_s26 + $0x180] sm:$0xff]  ;;  %v313_v25 = vld [vmem:[%s1408_s26 + $0x190] sm:$0xff] }
  0x21   : > { %v315_v26 = vld [vmem:[%s1408_s26 + $0x1a0] sm:$0xff]  ;;  %312 = vst [vmem:[%s1416_s27 + $0xc0] sm:$0xff] %v311_v24  ;;  %314 = vst [vmem:[%s1416_s27 + $0xc8] sm:$0xff] %v313_v25  ;;  %v317_v27 = vld [vmem:[%s1408_s26 + $0x1b0] sm:$0xff] }
  0x22   : > { %316 = vst [vmem:[%s1416_s27 + $0xd0] sm:$0xff] %v315_v26  ;;  %v319_v28 = vld [vmem:[%s1408_s26 + $0x1c0] sm:$0xff]  ;;  %v321_v29 = vld [vmem:[%s1408_s26 + $0x1d0] sm:$0xff]  ;;  %318 = vst [vmem:[%s1416_s27 + $0xd8] sm:$0xff] %v317_v27 }
  0x23   : > { %320 = vst [vmem:[%s1416_s27 + $0xe0] sm:$0xff] %v319_v28  ;;  %322 = vst [vmem:[%s1416_s27 + $0xe8] sm:$0xff] %v321_v29  ;;  %v323_v30 = vld [vmem:[%s1408_s26 + $0x1e0] sm:$0xff]  ;;  %v325_v31 = vld [vmem:[%s1408_s26 + $0x1f0] sm:$0xff] }
  0x24   : > { %v327_v32 = vld [vmem:[%s1408_s26 + $0x200] sm:$0xff]  ;;  %324 = vst [vmem:[%s1416_s27 + $0xf0] sm:$0xff] %v323_v30  ;;  %326 = vst [vmem:[%s1416_s27 + $0xf8] sm:$0xff] %v325_v31  ;;  %v329_v33 = vld [vmem:[%s1408_s26 + $0x210] sm:$0xff] }
  0x25   : > { %328 = vst [vmem:[%s1416_s27 + $0x100] sm:$0xff] %v327_v32  ;;  %v331_v34 = vld [vmem:[%s1408_s26 + $0x220] sm:$0xff]  ;;  %v333_v35 = vld [vmem:[%s1408_s26 + $0x230] sm:$0xff]  ;;  %330 = vst [vmem:[%s1416_s27 + $0x108] sm:$0xff] %v329_v33 }
  0x26   : > { %332 = vst [vmem:[%s1416_s27 + $0x110] sm:$0xff] %v331_v34  ;;  %334 = vst [vmem:[%s1416_s27 + $0x118] sm:$0xff] %v333_v35  ;;  %v335_v36 = vld [vmem:[%s1408_s26 + $0x240] sm:$0xff]  ;;  %v337_v37 = vld [vmem:[%s1408_s26 + $0x250] sm:$0xff] }
  0x27   : > { %v339_v38 = vld [vmem:[%s1408_s26 + $0x260] sm:$0xff]  ;;  %336 = vst [vmem:[%s1416_s27 + $0x120] sm:$0xff] %v335_v36  ;;  %338 = vst [vmem:[%s1416_s27 + $0x128] sm:$0xff] %v337_v37  ;;  %v341_v39 = vld [vmem:[%s1408_s26 + $0x270] sm:$0xff] }
  0x28   : > { %340 = vst [vmem:[%s1416_s27 + $0x130] sm:$0xff] %v339_v38  ;;  %v343_v40 = vld [vmem:[%s1408_s26 + $0x280] sm:$0xff]  ;;  %v345_v41 = vld [vmem:[%s1408_s26 + $0x290] sm:$0xff]  ;;  %342 = vst [vmem:[%s1416_s27 + $0x138] sm:$0xff] %v341_v39 }
  0x29   : > { %344 = vst [vmem:[%s1416_s27 + $0x140] sm:$0xff] %v343_v40  ;;  %346 = vst [vmem:[%s1416_s27 + $0x148] sm:$0xff] %v345_v41  ;;  %v347_v42 = vld [vmem:[%s1408_s26 + $0x2a0] sm:$0xff]  ;;  %v349_v43 = vld [vmem:[%s1408_s26 + $0x2b0] sm:$0xff] }
  0x2a   : > { %v351_v44 = vld [vmem:[%s1408_s26 + $0x2c0] sm:$0xff]  ;;  %348 = vst [vmem:[%s1416_s27 + $0x150] sm:$0xff] %v347_v42  ;;  %350 = vst [vmem:[%s1416_s27 + $0x158] sm:$0xff] %v349_v43  ;;  %v353_v45 = vld [vmem:[%s1408_s26 + $0x2d0] sm:$0xff] }
  0x2b   : > { %352 = vst [vmem:[%s1416_s27 + $0x160] sm:$0xff] %v351_v44  ;;  %v355_v46 = vld [vmem:[%s1408_s26 + $0x2e0] sm:$0xff]  ;;  %v357_v47 = vld [vmem:[%s1408_s26 + $0x2f0] sm:$0xff]  ;;  %354 = vst [vmem:[%s1416_s27 + $0x168] sm:$0xff] %v353_v45 }
  0x2c   : > { %356 = vst [vmem:[%s1416_s27 + $0x170] sm:$0xff] %v355_v46  ;;  %358 = vst [vmem:[%s1416_s27 + $0x178] sm:$0xff] %v357_v47  ;;  %v359_v48 = vld [vmem:[%s1408_s26 + $0x300] sm:$0xff]  ;;  %v361_v49 = vld [vmem:[%s1408_s26 + $0x310] sm:$0xff] }
  0x2d   : > { %360 = vst [vmem:[%s1416_s27 + $0x180] sm:$0xff] %v359_v48  ;;  %362 = vst [vmem:[%s1416_s27 + $0x188] sm:$0xff] %v361_v49 }
  0x2e PF: > { %p1090_p7 = scmp.ge.s32.totalorder %s1345_s14, 1  ;;  %p367_p8 = scmp.lt.s32.totalorder %s1345_s14, 3 }
  0x30   : > { %p368_p9 = pnand %p1090_p7, %p367_p8 }
  0x31   : > { %s374_s28 = sand.u32 (!%p368_p9), 1, %s1337_s12   ;;  %vm769_vm0 = vcmask (!%p368_p9), 130048   ;;  %v1297_v50 = vld [vmem:[%s1646_s0 + $0xc] ss:$16 sps:$4 sm:$0xff] (!%p368_p9)   ;;  %v1300_v51 = vld [vmem:[%s1646_s0 + $0x4] ss:$16 sps:$4 sm:$0xff] (!%p368_p9)  }
  0x32   : > { %371 = sbr.rel (%p368_p9) target bundleno = 379 (0x17b), region = 66  ;;  %v1347_v52 = vmov (!%p368_p9), 0   ;;  %1150 = vmatprep.mubr.msk.bf16.mxu0 (!%p368_p9), %vm769_vm0, %v1297_v50  ;;  %808 = vmatprep.mubr.bf16.mxu1 (!%p368_p9), %v1300_v51  ;;  %v457_v23 = vld [vmem:[%s1648_s2] sm:$0xff] (!%p368_p9)  ;;  %v459_v25 = vld [vmem:[%s1648_s2 + $0x10] sm:$0xff] (!%p368_p9)  ;;  %v458_v27 = vld [vmem:[%s1648_s2 + $0x8] sm:$0xff] (!%p368_p9) }
  0x33   : > { %s1192_s29 = smul.u32 (!%p368_p9), 400, %s374_s28  ;;  %1218 = vset.pattern.permute.xlu0 (!%p368_p9), %v1347_v52  ;;  %1219 = vset.pattern.permute.xlu1 (!%p368_p9), %v1347_v52  ;;  %v460_v29 = vld [vmem:[%s1648_s2 + $0x18] sm:$0xff] (!%p368_p9)  ;;  %v1298_v46 = vld [vmem:[%s1646_s0] ss:$16 sps:$4 sm:$0xff] (!%p368_p9)   ;;  %v1303_v47 = vld [vmem:[%s1646_s0 + $0x24] ss:$16 sps:$4 sm:$0xff] (!%p368_p9)  }
  0x34   : > { %463 = vperm.xlu0 (!%p368_p9), %1218, %v457_v23   ;;  %473 = vperm.xlu1 (!%p368_p9), %1219, %v459_v25   ;;  %v1295_v36 = vld [vmem:[%s1646_s0 + $0x8] ss:$16 sps:$4 sm:$0xff] (!%p368_p9)   ;;  %v1301_v37 = vld [vmem:[%s1646_s0 + $0x2c] ss:$16 sps:$4 sm:$0xff] (!%p368_p9)   ;;  %v1306_v48 = vld [vmem:[%s1646_s0 + $0x20] ss:$16 sps:$4 sm:$0xff] (!%p368_p9)  }
  0x35   : > { %s1524_s7 = scalar_lea.vmem (!%p368_p9), [#allocation2], %s1192_s29  ;;  %v1305_v42 = vld [vmem:[%s1646_s0 + $0x28] ss:$16 sps:$4 sm:$0xff] (!%p368_p9)  }
  0x36   : > { %v1220_v53 = vld [vmem:[%s1524_s7 + $0x4] ss:$8 sps:$4 sm:$0xff] (!%p368_p9)   ;;  %v1222_v54 = vld [vmem:[%s1524_s7] ss:$8 sps:$4 sm:$0xff] (!%p368_p9)   ;;  %v1223_v55 = vld [vmem:[%s1524_s7 + $0x14] ss:$8 sps:$4 sm:$0xff] (!%p368_p9)  }
  0x37   : > { %776 = vmatprep.subr.bf16.mxu1 (!%p368_p9), %v1220_v53  ;;  %v1225_v56 = vld [vmem:[%s1524_s7 + $0x10] ss:$8 sps:$4 sm:$0xff] (!%p368_p9)   ;;  %v1226_v57 = vld [vmem:[%s1524_s7 + $0x24] ss:$8 sps:$4 sm:$0xff] (!%p368_p9)   ;;  %v1228_v58 = vld [vmem:[%s1524_s7 + $0x20] ss:$8 sps:$4 sm:$0xff] (!%p368_p9)  }
  0x38   : > { %777 = vmatpush1.bf16.msra.mxu1 (!%p368_p9), %v1222_v54  ;;  %v1229_v59 = vld [vmem:[%s1524_s7 + $0x34] ss:$8 sps:$4 sm:$0xff] (!%p368_p9)   ;;  %v1241_v60 = vld [vmem:[%s1524_s7 + $0x104] ss:$8 sps:$4 sm:$0xff] (!%p368_p9)   ;;  %v1231_v61 = vld [vmem:[%s1524_s7 + $0x30] ss:$8 sps:$4 sm:$0xff] (!%p368_p9)   ;;  %468 = vperm.xlu0 (!%p368_p9), %1218, %v458_v27  }
  0x39   : > { %778 = vmatprep.subr.bf16.mxu1 %v1223_v55  ;;  %v1232_v62 = vld [vmem:[%s1524_s7 + $0x44] ss:$8 sps:$4 sm:$0xff]   ;;  %v1245_v63 = vld [vmem:[%s1524_s7 + $0x100] ss:$8 sps:$4 sm:$0xff]   ;;  %829 = vmatprep.subr.bf16.mxu0 %v1241_v60  ;;  %v1247_v0 = vld [vmem:[%s1524_s7 + $0x114] ss:$8 sps:$4 sm:$0xff]  }
  0x3a   : > { %830 = vmatpush1.bf16.msra.mxu0 %v1245_v63  ;;  %v1234_v1 = vld [vmem:[%s1524_s7 + $0x40] ss:$8 sps:$4 sm:$0xff]   ;;  %v1251_v2 = vld [vmem:[%s1524_s7 + $0x110] ss:$8 sps:$4 sm:$0xff]   ;;  %v1253_v3 = vld [vmem:[%s1524_s7 + $0x124] ss:$8 sps:$4 sm:$0xff]   ;;  %478 = vperm.xlu1 %1219, %v460_v29  }
  0x3b   : > { %831 = vmatprep.subr.bf16.mxu0 %v1247_v0  ;;  %v1235_v4 = vld [vmem:[%s1524_s7 + $0x54] ss:$8 sps:$4 sm:$0xff]   ;;  %v1257_v5 = vld [vmem:[%s1524_s7 + $0x120] ss:$8 sps:$4 sm:$0xff]   ;;  %v1237_v7 = vld [vmem:[%s1524_s7 + $0x50] ss:$8 sps:$4 sm:$0xff]  }
  0x3c   : > { %779 = vmatpush1.bf16.msra.mxu1 %v1225_v56  ;;  %v1259_v6 = vld [vmem:[%s1524_s7 + $0x134] ss:$8 sps:$4 sm:$0xff]   ;;  %v1238_v8 = vld [vmem:[%s1524_s7 + $0x64] ss:$8 sps:$4 sm:$0xff]   ;;  %v1263_v9 = vld [vmem:[%s1524_s7 + $0x130] ss:$8 sps:$4 sm:$0xff]  }
  0x3d   : > { %780 = vmatprep.subr.bf16.mxu1 %v1226_v57  ;;  %v1265_v10 = vld [vmem:[%s1524_s7 + $0x144] ss:$8 sps:$4 sm:$0xff]   ;;  %v1240_v11 = vld [vmem:[%s1524_s7 + $0x60] ss:$8 sps:$4 sm:$0xff]   ;;  %v1243_v12 = vld [vmem:[%s1524_s7 + $0x74] ss:$8 sps:$4 sm:$0xff]  }
  0x3e   : > { %832 = vmatpush1.bf16.msra.mxu0 %v1251_v2  ;;  %v1269_v13 = vld [vmem:[%s1524_s7 + $0x140] ss:$8 sps:$4 sm:$0xff]   ;;  %v1271_v14 = vld [vmem:[%s1524_s7 + $0x154] ss:$8 sps:$4 sm:$0xff]   ;;  %v1246_v15 = vld [vmem:[%s1524_s7 + $0x70] ss:$8 sps:$4 sm:$0xff]  }
  0x3f   : > { %833 = vmatprep.subr.bf16.mxu0 %v1253_v3  ;;  %v1249_v16 = vld [vmem:[%s1524_s7 + $0x84] ss:$8 sps:$4 sm:$0xff]   ;;  %v1275_v17 = vld [vmem:[%s1524_s7 + $0x150] ss:$8 sps:$4 sm:$0xff]   ;;  %v1252_v19 = vld [vmem:[%s1524_s7 + $0x80] ss:$8 sps:$4 sm:$0xff]  }
  0x40   : > { %781 = vmatpush1.bf16.msra.mxu1 %v1228_v58  ;;  %v1277_v18 = vld [vmem:[%s1524_s7 + $0x164] ss:$8 sps:$4 sm:$0xff]   ;;  %v1255_v20 = vld [vmem:[%s1524_s7 + $0x94] ss:$8 sps:$4 sm:$0xff]   ;;  %v1281_v21 = vld [vmem:[%s1524_s7 + $0x160] ss:$8 sps:$4 sm:$0xff]  }
  0x41   : > { %782 = vmatprep.subr.bf16.mxu1 %v1229_v59  ;;  %v1283_v22 = vld [vmem:[%s1524_s7 + $0x174] ss:$8 sps:$4 sm:$0xff]   ;;  %v1258_v24 = vld [vmem:[%s1524_s7 + $0x90] ss:$8 sps:$4 sm:$0xff]   ;;  %v1261_v26 = vld [vmem:[%s1524_s7 + $0xa4] ss:$8 sps:$4 sm:$0xff]  }
  0x42   : > { %834 = vmatpush1.bf16.msra.mxu0 %v1257_v5  ;;  %v1287_v28 = vld [vmem:[%s1524_s7 + $0x170] ss:$8 sps:$4 sm:$0xff]   ;;  %v1289_v30 = vld [vmem:[%s1524_s7 + $0x184] ss:$8 sps:$4 sm:$0xff]   ;;  %v1264_v31 = vld [vmem:[%s1524_s7 + $0xa0] ss:$8 sps:$4 sm:$0xff]  }
  0x43   : > { %835 = vmatprep.subr.bf16.mxu0 %v1259_v6  ;;  %v1267_v32 = vld [vmem:[%s1524_s7 + $0xb4] ss:$8 sps:$4 sm:$0xff]   ;;  %v1293_v33 = vld [vmem:[%s1524_s7 + $0x180] ss:$8 sps:$4 sm:$0xff]   ;;  %v1270_v34 = vld [vmem:[%s1524_s7 + $0xb0] ss:$8 sps:$4 sm:$0xff]  }
  0x44   : > { %783 = vmatpush1.bf16.msra.mxu1 %v1231_v61  ;;  %v1273_v35 = vld [vmem:[%s1524_s7 + $0xc4] ss:$8 sps:$4 sm:$0xff]   ;;  %v1276_v38 = vld [vmem:[%s1524_s7 + $0xc0] ss:$8 sps:$4 sm:$0xff]   ;;  %v1279_v39 = vld [vmem:[%s1524_s7 + $0xd4] ss:$8 sps:$4 sm:$0xff]  }
  0x45   : > { %784 = vmatprep.subr.bf16.mxu1 %v1232_v62  ;;  %v1282_v40 = vld [vmem:[%s1524_s7 + $0xd0] ss:$8 sps:$4 sm:$0xff]   ;;  %v1285_v41 = vld [vmem:[%s1524_s7 + $0xe4] ss:$8 sps:$4 sm:$0xff]   ;;  %v1288_v43 = vld [vmem:[%s1524_s7 + $0xe0] ss:$8 sps:$4 sm:$0xff]  }
  0x46   : > { %836 = vmatpush1.bf16.msra.mxu0 %v1263_v9  ;;  %v1291_v44 = vld [vmem:[%s1524_s7 + $0xf4] ss:$8 sps:$4 sm:$0xff]   ;;  %v1294_v45 = vld [vmem:[%s1524_s7 + $0xf0] ss:$8 sps:$4 sm:$0xff]   ;;  %s1091_s7 = sshll.u32 %s374_s28, 5  ;;  %s1174_s28 = sshll.u32 (%p1398_p5), %s1084_s15, 3 }
  0x47   : > { %837 = vmatprep.subr.bf16.mxu0 %v1265_v10  ;;  %s1615_s12 = scalar_lea.vmem [#allocation3], %s1091_s7  ;;  %s983_s17 = scalar_lea.vmem (%p1398_p5), %s1649_s3, %s1174_s28 }
  0x48   : > { %785 = vmatpush1.bf16.msra.mxu1 %v1234_v1 }
  0x49   : > { %786 = vmatprep.subr.bf16.mxu1 %v1235_v4 }
  0x4a   : > { %838 = vmatpush1.bf16.msra.mxu0 %v1269_v13 }
  0x4b   : > { %839 = vmatprep.subr.bf16.mxu0 %v1271_v14 }
  0x4c   : > { %787 = vmatpush1.bf16.msra.mxu1 %v1237_v7 }
  0x4d   : > { %788 = vmatprep.subr.bf16.mxu1 %v1238_v8 }
  0x4e   : > { %840 = vmatpush1.bf16.msra.mxu0 %v1275_v17 }
  0x4f   : > { %841 = vmatprep.subr.bf16.mxu0 %v1277_v18 }
  0x50   : > { %789 = vmatpush1.bf16.msra.mxu1 %v1240_v11 }
  0x51   : > { %790 = vmatprep.subr.bf16.mxu1 %v1243_v12 }
  0x52   : > { %842 = vmatpush1.bf16.msra.mxu0 %v1281_v21 }
  0x53   : > { %843 = vmatprep.subr.bf16.mxu0 %v1283_v22 }
  0x54   : > { %791 = vmatpush1.bf16.msra.mxu1 %v1246_v15 }
  0x55   : > { %792 = vmatprep.subr.bf16.mxu1 %v1249_v16 }
  0x56   : > { %844 = vmatpush1.bf16.msra.mxu0 %v1287_v28 }
  0x57   : > { %845 = vmatprep.subr.bf16.mxu0 %v1289_v30 }
  0x58   : > { %793 = vmatpush1.bf16.msra.mxu1 %v1252_v19 }
  0x59   : > { %794 = vmatprep.subr.bf16.mxu1 %v1255_v20 }
  0x5a   : > { %846 = vmatpush1.bf16.msra.mxu0 %v1293_v33 }
  0x5c   : > { %795 = vmatpush1.bf16.msra.mxu1 %v1258_v24 }
  0x5d   : > { %796 = vmatprep.subr.bf16.mxu1 %v1261_v26  ;;  %862 = vmatmul.mubr.bf16.vlgmr.msra.gmra.mrb[0].mxu0 %v1295_v36 }
  0x5e   : > { %1151 = vmatprep.mubr.msk.bf16.mxu0 %vm769_vm0, %v1301_v37 }
  0x60   : > { %797 = vmatpush1.bf16.msra.mxu1 %v1264_v31 }
  0x61   : > { %798 = vmatprep.subr.bf16.mxu1 %v1267_v32 }
  0x64   : > { %799 = vmatpush1.bf16.msra.mxu1 %v1270_v34 }
  0x65   : > { %800 = vmatprep.subr.bf16.mxu1 %v1273_v35  ;;  %872 = vmatmul.mubr.bf16.gmra.mrb[4].mxu0 %v1305_v42 }
  0x68   : > { %801 = vmatpush1.bf16.msra.mxu1 %v1276_v38 }
  0x69   : > { %802 = vmatprep.subr.bf16.mxu1 %v1279_v39 }
  0x6c   : > { %803 = vmatpush1.bf16.msra.mxu1 %v1282_v40 }
  0x6d   : > { %804 = vmatprep.subr.bf16.mxu1 %v1285_v41 }
  0x70   : > { %805 = vmatpush1.bf16.msra.mxu1 %v1288_v43 }
  0x71   : > { %806 = vmatprep.subr.bf16.mxu1 %v1291_v44 }
  0x74   : > { %807 = vmatpush1.bf16.msra.mxu1 %v1294_v45 }
  0x77   : > { %809 = vmatmul.mubr.bf16.vlgmr.msra.gmra.mrb[0].mxu1 %v1298_v46 }
  0x78   : > { %818 = vmatprep.mubr.bf16.mxu1 %v1303_v47 }
  0x7f   : > { %819 = vmatmul.mubr.bf16.gmra.mrb[4].mxu1 %v1306_v48 }
  0xb3   : > { %v464_v57 = vpop.permute.xlu0 %463  ;;  %v474_v4 = vpop.permute.xlu1 %473 }
  0xb7   : > { %v469_v59 = vpop.permute.xlu0 %468 }
  0xb9   : > { %v479_v19 = vpop.permute.xlu1 %478 }
 0x130   : > { %v863_v49 = vpop.f32.mrb[0].mxu0 }
 0x131   : > { %v865_v50 = vpop.f32.mrb[1].mxu0 }
 0x132   : > { %v867_v51 = vpop.f32.mrb[2].mxu0 }
 0x133   : > { %v869_v52 = vpop.f32.mrb[3].mxu0 }
 0x138   : > { %v873_v53 = vpop.f32.mrb[4].mxu0 }
 0x139   : > { %v875_v54 = vpop.f32.mrb[5].mxu0 }
 0x13a   : > { %v877_v55 = vpop.f32.mrb[6].mxu0 }
 0x13b   : > { %v879_v56 = vpop.f32.mrb[7].mxu0 }
 0x14a   : > { %v810_v58 = vpop.f32.mrb[0].mxu1 }
 0x14b   : > { %v811_v60 = vadd.f32 %v810_v58, %v464_v57  ;;  %v812_v61 = vpop.f32.mrb[1].mxu1 }
 0x14c   : > { %v813_v62 = vadd.f32 %v812_v61, %v464_v57  ;;  %v814_v63 = vpop.f32.mrb[2].mxu1 }
 0x14d   : > { %v864_v0 = vadd.f32 %v863_v49, %v811_v60  ;;  %v815_v1 = vadd.f32 %v814_v63, %v469_v59  ;;  %v816_v2 = vpop.f32.mrb[3].mxu1 }
 0x14e   : > { %v866_v3 = vadd.f32 %v865_v50, %v813_v62  ;;  %v817_v5 = vadd.f32 %v816_v2, %v469_v59 }
 0x14f   : > { %v890_v6 = vmin.f32 %v864_v0, 0.0  ;;  %v868_v7 = vadd.f32 %v867_v51, %v815_v1  ;;  %vm882_vm1 = vcmp.gt.f32.partialorder %v864_v0, 0.0 }
 0x150   : > { %v891_v8 = vmin.f32 %v866_v3, 0.0  ;;  %v870_v9 = vadd.f32 %v869_v52, %v817_v5  ;;  %vm883_vm2 = vcmp.gt.f32.partialorder %v866_v3, 0.0 }
 0x151   : > { %v898_v10 = vmul.f32 1.442695, %v890_v6  ;;  %v892_v11 = vmin.f32 %v868_v7, 0.0  ;;  %vm884_vm3 = vcmp.gt.f32.partialorder %v868_v7, 0.0 }
 0x152   : > { %v900_v12 = vmul.f32 1.442695, %v891_v8  ;;  %v893_v13 = vmin.f32 %v870_v9, 0.0  ;;  %v820_v14 = vpop.f32.mrb[4].mxu1  ;;  %vm885_vm4 = vcmp.gt.f32.partialorder %v870_v9, 0.0 }
 0x153   : > { %1307 = vpow2.f32 %v898_v10  ;;  %v902_v15 = vmul.f32 1.442695, %v892_v11  ;;  %v821_v16 = vadd.f32 %v820_v14, %v474_v4  ;;  %v822_v17 = vpop.f32.mrb[5].mxu1 }
 0x154   : > { %1309 = vpow2.f32 %v900_v12  ;;  %v904_v18 = vmul.f32 1.442695, %v893_v13  ;;  %v823_v20 = vadd.f32 %v822_v17, %v474_v4  ;;  %v824_v21 = vpop.f32.mrb[6].mxu1 }
 0x155   : > { %1311 = vpow2.f32 %v902_v15  ;;  %v874_v22 = vadd.f32 %v873_v53, %v821_v16  ;;  %v825_v23 = vadd.f32 %v824_v21, %v479_v19  ;;  %v826_v24 = vpop.f32.mrb[7].mxu1 }
 0x156   : > { %1313 = vpow2.f32 %v904_v18  ;;  %v876_v25 = vadd.f32 %v875_v54, %v823_v20  ;;  %v827_v26 = vadd.f32 %v826_v24, %v479_v19 }
 0x157   : > { %v894_v27 = vmin.f32 %v874_v22, 0.0  ;;  %v1607_v28 = vadd.f32 %v877_v55, %v825_v23  ;;  %vm886_vm5 = vcmp.gt.f32.partialorder %v874_v22, 0.0 }
 0x158   : > { %v895_v29 = vmin.f32 %v876_v25, 0.0  ;;  %v1609_v30 = vadd.f32 %v879_v56, %v827_v26  ;;  %vm887_vm6 = vcmp.gt.f32.partialorder %v876_v25, 0.0 }
 0x159   : > { %v906_v31 = vmul.f32 1.442695, %v894_v27  ;;  %v896_v32 = vmin.f32 %v1607_v28, 0.0  ;;  %vm888_vm7 = vcmp.gt.f32.partialorder %v1607_v28, 0.0 }
 0x15a   : > { %v908_v33 = vmul.f32 1.442695, %v895_v29  ;;  %v897_v34 = vmin.f32 %v1609_v30, 0.0  ;;  %vm889_vm8 = vcmp.gt.f32.partialorder %v1609_v30, 0.0 }
 0x15b   : > { %1315 = vpow2.f32 %v906_v31  ;;  %v910_v35 = vmul.f32 1.442695, %v896_v32 }
 0x15c   : > { %1317 = vpow2.f32 %v908_v33  ;;  %v912_v36 = vmul.f32 1.442695, %v897_v34 }
 0x15d   : > { %v1308_v37 = vpop.eup %1307  ;;  %1319 = vpow2.f32 %v910_v35 }
 0x15e   : > { %v1310_v38 = vpop.eup %1309  ;;  %v1152_v39 = vadd.f32 -1.0, %v1308_v37  ;;  %1321 = vpow2.f32 %v912_v36 }
 0x15f   : > { %v1312_v40 = vpop.eup %1311  ;;  %v1153_v41 = vadd.f32 -1.0, %v1310_v38 }
 0x160   : > { %v1314_v42 = vpop.eup %1313  ;;  %v922_v43 = vmul.f32 1.6732632, %v1152_v39  ;;  %v1154_v44 = vadd.f32 -1.0, %v1312_v40 }
 0x161   : > { %v923_v45 = vmul.f32 1.6732632, %v1153_v41  ;;  %v1155_v46 = vadd.f32 -1.0, %v1314_v42 }
 0x162   : > { %v930_v47 = vsel %vm882_vm1, %v864_v0, %v922_v43  ;;  %v924_v48 = vmul.f32 1.6732632, %v1154_v44 }
 0x163   : > { %v938_v49 = vmul.f32 1.050701, %v930_v47  ;;  %v931_v50 = vsel %vm883_vm2, %v866_v3, %v923_v45  ;;  %v925_v51 = vmul.f32 1.6732632, %v1155_v46 }
 0x164   : > { %v939_v52 = vmul.f32 1.050701, %v931_v50  ;;  %v932_v53 = vsel %vm884_vm3, %v868_v7, %v924_v48 }
 0x165   : > { %v1316_v54 = vpop.eup %1315  ;;  %v940_v55 = vmul.f32 1.050701, %v932_v53  ;;  %v933_v56 = vsel %vm885_vm4, %v870_v9, %v925_v51 }
 0x166   : > { %v1318_v57 = vpop.eup %1317  ;;  %v1170_v58 = vpack.c.bf16 %v939_v52, %v938_v49  ;;  %v941_v59 = vmul.f32 1.050701, %v933_v56  ;;  %v1156_v60 = vadd.f32 -1.0, %v1316_v54 }
 0x167   : > { %v1320_v61 = vpop.eup %1319  ;;  %v1157_v62 = vadd.f32 -1.0, %v1318_v57 }
 0x168   : > { %v1322_v63 = vpop.eup %1321  ;;  %970 = vst [vmem:[%s1615_s12] sm:$0xff] %v1170_v58  ;;  %v1171_v0 = vpack.c.bf16 %v941_v59, %v940_v55  ;;  %v926_v1 = vmul.f32 1.6732632, %v1156_v60  ;;  %v1158_v2 = vadd.f32 -1.0, %v1320_v61 }
 0x169   : > { %v927_v3 = vmul.f32 1.6732632, %v1157_v62  ;;  %v1159_v4 = vadd.f32 -1.0, %v1322_v63 }
 0x16a   : > { %971 = vst [vmem:[%s1615_s12 + $0x8] sm:$0xff] %v1171_v0  ;;  %v934_v5 = vsel %vm886_vm5, %v874_v22, %v926_v1  ;;  %v928_v6 = vmul.f32 1.6732632, %v1158_v2 }
 0x16b   : > { %v942_v7 = vmul.f32 1.050701, %v934_v5  ;;  %v935_v8 = vsel %vm887_vm6, %v876_v25, %v927_v3  ;;  %v929_v9 = vmul.f32 1.6732632, %v1159_v4 }
 0x16c   : > { %v943_v10 = vmul.f32 1.050701, %v935_v8  ;;  %v936_v11 = vsel %vm888_vm7, %v1607_v28, %v928_v6  ;;  %980 = sbr.rel (!%p1398_p5) target bundleno = 379 (0x17b), region = 74 }
 0x16d   : > { %v944_v12 = vmul.f32 1.050701, %v936_v11  ;;  %v937_v13 = vsel %vm889_vm8, %v1609_v30, %v929_v9 }
 0x16e   : > { %v1172_v14 = vpack.c.bf16 %v943_v10, %v942_v7  ;;  %v945_v15 = vmul.f32 1.050701, %v937_v13 }
 0x16f   : > { %v1017_v17 = vld [vmem:[%s1615_s12] sm:$0xff] (%p1398_p5) }
 0x170   : > { %972 = vst [vmem:[%s1615_s12 + $0x10] sm:$0xff] %v1172_v14  ;;  %v1173_v16 = vpack.c.bf16 %v945_v15, %v944_v12  ;;  %1018 = vst [vmem:[%s983_s17] sm:$0xff] (%p1398_p5), %v1017_v17 }
 0x171   : > { %v1019_v18 = vld [vmem:[%s1615_s12 + $0x8] sm:$0xff] (%p1398_p5) }
 0x172   : > { %973 = vst [vmem:[%s1615_s12 + $0x18] sm:$0xff] %v1173_v16  ;;  %1020 = vst [vmem:[%s983_s17 + $0x10] sm:$0xff] (%p1398_p5), %v1019_v18 }
 0x177   : > { %v1021_v19 = vld [vmem:[%s1615_s12 + $0x10] sm:$0xff] }
 0x178   : > { %1022 = vst [vmem:[%s983_s17 + $0x20] sm:$0xff] %v1021_v19 }
 0x179   : > { %v1023_v20 = vld [vmem:[%s1615_s12 + $0x18] sm:$0xff] }
 0x17a   : > { %1024 = vst [vmem:[%s983_s17 + $0x30] sm:$0xff] %v1023_v20 }
 0x17b PF: > { %p10_p10 = scmp.ge.s32.totalorder %s1385_s16, 4   ;;  %s1651_s12 = smov %s1341_s13 }
 0x17c   : > { %s1652_s13 = smov %s1396_s19  ;;  %s1653_s14 = smov %s1385_s16 }
 0x17d   :  { %12 = sbr.rel (!%p10_p10) target bundleno = 2 (0x2), region = 143 }

// kernel: cnn_forward.6
= control target key start
LH: loop header
LB: loop body
LE: loop exit
PB: predicated region body
PF: predicated region fallthrough
CT: control target
= control target key end

     0   :  { %s1459_s12 = smov 0   ;;  %s1461_s13 = smov 0   ;;  %s1834_s0 = inlined_call_operand.vmem [shape: bf16[64,288], index: 0, kind: input, shape index: {}]   ;;  %s1835_s1 = inlined_call_operand.vmem [shape: bf16[288,512], index: 1, kind: input, shape index: {}]   ;;  %s1836_s2 = inlined_call_operand.vmem [shape: f32[64,1], index: 2, kind: input, shape index: {}]   ;;  %s1837_s3 = inlined_call_operand.vmem [shape: bf16[64,512], index: 3, kind: output, shape index: {}]  }
   0x1   :  { %s1463_s14 = smov 0  }
   0x2 LB: > { %s1152_s15 = sadd.s32 4294967295, %s1436_s14   ;;  %s1476_s16 = sadd.s32 1, %s1436_s14   ;;  %s1436_s14 = sphi %s1463_s14, %s1841_s14   ;;  %s1432_s13 = sphi %s1461_s13, %s1840_s13   ;;  %s1428_s12 = sphi %s1459_s12, %s1839_s12  }
   0x3   : > { %s38_s17 = ssub.s32 %s1436_s14, %s1476_s16  ;;  %s41_s18 = sadd.s32 1, %s1432_s13 }
   0x4   : > { %p39_p0 = scmp.eq.s32.totalorder %s38_s17, 0  ;;  %p48_p1 = scmp.ne.s32.totalorder %s1432_s13, %s1428_s12 }
   0x5   : > { %p49_p2 = scmp.eq.s32.totalorder %s1436_s14, 0  ;;  %p99_p3 = scmp.eq.s32.totalorder %s1152_s15, 1 }
   0x6   : > { %s1487_s19 = scalar_select %p39_p0, %s1432_s13, %s41_s18  }
   0x7   : > { %p50_p4 = por %p49_p2, %p48_p1  ;;  %p1489_p5 = por %p99_p3, %p48_p1 }
   0x8   : > { %p1155_p6 = scmp.ge.s32.totalorder %s1436_s14, 2 }
   0xa   : > { %127 = sbr.rel (%p1155_p6) target bundleno = 39 (0x27), region = 24 }
  0x11   : > { %130 = sbr.rel (!%p50_p4) target bundleno = 39 (0x27), region = 28  ;;  %s132_s21 = sand.u32 (%p50_p4), 1, %s1432_s13  }
  0x12   : > { %s1241_s22 = sshll.u32 (%p50_p4), %s1436_s14, 3  ;;  %s1283_s23 = smul.u32 (%p50_p4), 288, %s132_s21 }
  0x13   : > { %s1499_s26 = scalar_lea.vmem (%p50_p4), %s1835_s1, %s1241_s22 }
  0x14   : > { %v235_v0 = vld [vmem:[%s1499_s26] sm:$0xff] (%p50_p4)  ;;  %v237_v1 = vld [vmem:[%s1499_s26 + $0x10] sm:$0xff] (%p50_p4)  ;;  %s1507_s27 = scalar_lea.vmem (%p50_p4), [#allocation2], %s1283_s23 }
  0x15   : > { %v239_v2 = vld [vmem:[%s1499_s26 + $0x20] sm:$0xff] (%p50_p4)  ;;  %v241_v3 = vld [vmem:[%s1499_s26 + $0x30] sm:$0xff] (%p50_p4)  ;;  %236 = vst [vmem:[%s1507_s27] sm:$0xff] (%p50_p4), %v235_v0  ;;  %238 = vst [vmem:[%s1507_s27 + $0x8] sm:$0xff] (%p50_p4), %v237_v1 }
  0x16   : > { %v243_v4 = vld [vmem:[%s1499_s26 + $0x40] sm:$0xff] (%p50_p4)  ;;  %v245_v5 = vld [vmem:[%s1499_s26 + $0x50] sm:$0xff] (%p50_p4)  ;;  %240 = vst [vmem:[%s1507_s27 + $0x10] sm:$0xff] (%p50_p4), %v239_v2  ;;  %242 = vst [vmem:[%s1507_s27 + $0x18] sm:$0xff] (%p50_p4), %v241_v3 }
  0x17   : > { %244 = vst [vmem:[%s1507_s27 + $0x20] sm:$0xff] (%p50_p4), %v243_v4  ;;  %246 = vst [vmem:[%s1507_s27 + $0x28] sm:$0xff] (%p50_p4), %v245_v5  ;;  %v247_v6 = vld [vmem:[%s1499_s26 + $0x60] sm:$0xff] (%p50_p4)  ;;  %v249_v7 = vld [vmem:[%s1499_s26 + $0x70] sm:$0xff] (%p50_p4) }
  0x18   : > { %v251_v8 = vld [vmem:[%s1499_s26 + $0x80] sm:$0xff]  ;;  %248 = vst [vmem:[%s1507_s27 + $0x30] sm:$0xff] %v247_v6  ;;  %250 = vst [vmem:[%s1507_s27 + $0x38] sm:$0xff] %v249_v7  ;;  %v253_v9 = vld [vmem:[%s1499_s26 + $0x90] sm:$0xff] }
  0x19   : > { %252 = vst [vmem:[%s1507_s27 + $0x40] sm:$0xff] %v251_v8  ;;  %v255_v10 = vld [vmem:[%s1499_s26 + $0xa0] sm:$0xff]  ;;  %v257_v11 = vld [vmem:[%s1499_s26 + $0xb0] sm:$0xff]  ;;  %254 = vst [vmem:[%s1507_s27 + $0x48] sm:$0xff] %v253_v9 }
  0x1a   : > { %256 = vst [vmem:[%s1507_s27 + $0x50] sm:$0xff] %v255_v10  ;;  %258 = vst [vmem:[%s1507_s27 + $0x58] sm:$0xff] %v257_v11  ;;  %v259_v12 = vld [vmem:[%s1499_s26 + $0xc0] sm:$0xff]  ;;  %v261_v13 = vld [vmem:[%s1499_s26 + $0xd0] sm:$0xff] }
  0x1b   : > { %v263_v14 = vld [vmem:[%s1499_s26 + $0xe0] sm:$0xff]  ;;  %260 = vst [vmem:[%s1507_s27 + $0x60] sm:$0xff] %v259_v12  ;;  %262 = vst [vmem:[%s1507_s27 + $0x68] sm:$0xff] %v261_v13  ;;  %v265_v15 = vld [vmem:[%s1499_s26 + $0xf0] sm:$0xff] }
  0x1c   : > { %264 = vst [vmem:[%s1507_s27 + $0x70] sm:$0xff] %v263_v14  ;;  %v267_v16 = vld [vmem:[%s1499_s26 + $0x100] sm:$0xff]  ;;  %v269_v17 = vld [vmem:[%s1499_s26 + $0x110] sm:$0xff]  ;;  %266 = vst [vmem:[%s1507_s27 + $0x78] sm:$0xff] %v265_v15 }
  0x1d   : > { %268 = vst [vmem:[%s1507_s27 + $0x80] sm:$0xff] %v267_v16  ;;  %270 = vst [vmem:[%s1507_s27 + $0x88] sm:$0xff] %v269_v17  ;;  %v271_v18 = vld [vmem:[%s1499_s26 + $0x120] sm:$0xff]  ;;  %v273_v19 = vld [vmem:[%s1499_s26 + $0x130] sm:$0xff] }
  0x1e   : > { %v275_v20 = vld [vmem:[%s1499_s26 + $0x140] sm:$0xff]  ;;  %272 = vst [vmem:[%s1507_s27 + $0x90] sm:$0xff] %v271_v18  ;;  %274 = vst [vmem:[%s1507_s27 + $0x98] sm:$0xff] %v273_v19  ;;  %v277_v21 = vld [vmem:[%s1499_s26 + $0x150] sm:$0xff] }
  0x1f   : > { %276 = vst [vmem:[%s1507_s27 + $0xa0] sm:$0xff] %v275_v20  ;;  %v279_v22 = vld [vmem:[%s1499_s26 + $0x160] sm:$0xff]  ;;  %v281_v23 = vld [vmem:[%s1499_s26 + $0x170] sm:$0xff]  ;;  %278 = vst [vmem:[%s1507_s27 + $0xa8] sm:$0xff] %v277_v21 }
  0x20   : > { %280 = vst [vmem:[%s1507_s27 + $0xb0] sm:$0xff] %v279_v22  ;;  %282 = vst [vmem:[%s1507_s27 + $0xb8] sm:$0xff] %v281_v23  ;;  %v283_v24 = vld [vmem:[%s1499_s26 + $0x180] sm:$0xff]  ;;  %v285_v25 = vld [vmem:[%s1499_s26 + $0x190] sm:$0xff] }
  0x21   : > { %v287_v26 = vld [vmem:[%s1499_s26 + $0x1a0] sm:$0xff]  ;;  %284 = vst [vmem:[%s1507_s27 + $0xc0] sm:$0xff] %v283_v24  ;;  %286 = vst [vmem:[%s1507_s27 + $0xc8] sm:$0xff] %v285_v25  ;;  %v289_v27 = vld [vmem:[%s1499_s26 + $0x1b0] sm:$0xff] }
  0x22   : > { %288 = vst [vmem:[%s1507_s27 + $0xd0] sm:$0xff] %v287_v26  ;;  %v291_v28 = vld [vmem:[%s1499_s26 + $0x1c0] sm:$0xff]  ;;  %v293_v29 = vld [vmem:[%s1499_s26 + $0x1d0] sm:$0xff]  ;;  %290 = vst [vmem:[%s1507_s27 + $0xd8] sm:$0xff] %v289_v27 }
  0x23   : > { %292 = vst [vmem:[%s1507_s27 + $0xe0] sm:$0xff] %v291_v28  ;;  %294 = vst [vmem:[%s1507_s27 + $0xe8] sm:$0xff] %v293_v29  ;;  %v295_v30 = vld [vmem:[%s1499_s26 + $0x1e0] sm:$0xff]  ;;  %v297_v31 = vld [vmem:[%s1499_s26 + $0x1f0] sm:$0xff] }
  0x24   : > { %v299_v32 = vld [vmem:[%s1499_s26 + $0x200] sm:$0xff]  ;;  %296 = vst [vmem:[%s1507_s27 + $0xf0] sm:$0xff] %v295_v30  ;;  %298 = vst [vmem:[%s1507_s27 + $0xf8] sm:$0xff] %v297_v31  ;;  %v301_v33 = vld [vmem:[%s1499_s26 + $0x210] sm:$0xff] }
  0x25   : > { %300 = vst [vmem:[%s1507_s27 + $0x100] sm:$0xff] %v299_v32  ;;  %v303_v34 = vld [vmem:[%s1499_s26 + $0x220] sm:$0xff]  ;;  %v305_v35 = vld [vmem:[%s1499_s26 + $0x230] sm:$0xff]  ;;  %302 = vst [vmem:[%s1507_s27 + $0x108] sm:$0xff] %v301_v33 }
  0x26   : > { %304 = vst [vmem:[%s1507_s27 + $0x110] sm:$0xff] %v303_v34  ;;  %306 = vst [vmem:[%s1507_s27 + $0x118] sm:$0xff] %v305_v35 }
  0x27 PF: > { %p1158_p7 = scmp.ge.s32.totalorder %s1436_s14, 1  ;;  %p311_p8 = scmp.lt.s32.totalorder %s1436_s14, 3 }
  0x29   : > { %p312_p9 = pnand %p1158_p7, %p311_p8 }
  0x2a   : > { %s318_s28 = sand.u32 (!%p312_p9), 1, %s1428_s12   ;;  %v1438_v36 = vmov (!%p312_p9), 0   ;;  %v1368_v37 = vld [vmem:[%s1834_s0 + $0x4] ss:$12 sps:$4 sm:$0xff] (!%p312_p9)   ;;  %v1369_v57 = vld [vmem:[%s1834_s0 + $0x8] ss:$12 sps:$4 sm:$0xff] (!%p312_p9)  }
  0x2b   : > { %315 = sbr.rel (%p312_p9) target bundleno = 395 (0x18b), region = 66  ;;  %801 = vmatprep.mubr.bf16.mxu0 (!%p312_p9), %v1438_v36  ;;  %1310 = vset.pattern.permute.xlu0 (!%p312_p9), %v1438_v36  ;;  %vm683_vm0 = vcmask (!%p312_p9), 261120   ;;  %v395_v60 = vld [vmem:[%s1836_s2] sm:$0xff] (!%p312_p9)  ;;  %v397_v61 = vld [vmem:[%s1836_s2 + $0x10] sm:$0xff] (!%p312_p9)  ;;  %v396_v63 = vld [vmem:[%s1836_s2 + $0x8] sm:$0xff] (!%p312_p9)  ;;  %s1745_s7 = sshll.u32 (!%p312_p9), %s318_s28, 6 }
  0x2c   : > { %s1284_s29 = smul.u32 (!%p312_p9), 288, %s318_s28  ;;  %1311 = vset.pattern.permute.xlu1 (!%p312_p9), %v1438_v36  ;;  %728 = vmatprep.mubr.bf16.mxu1 (!%p312_p9), %v1368_v37  ;;  %v398_v1 = vld [vmem:[%s1836_s2 + $0x18] sm:$0xff] (!%p312_p9)  ;;  %v1372_v2 = vld [vmem:[%s1834_s0 + $0x20] ss:$12 sps:$4 sm:$0xff] (!%p312_p9)   ;;  %v401_v8 = vld [vmem:[%s1836_s2 + $0x30] sm:$0xff] (!%p312_p9)  ;;  %s1770_s12 = scalar_lea.vmem (!%p312_p9), [#allocation3], %s1745_s7 }
  0x2d   : > { %405 = vperm.xlu0 (!%p312_p9), %1310, %v395_v60   ;;  %415 = vperm.xlu1 (!%p312_p9), %1311, %v397_v61   ;;  %v399_v4 = vld [vmem:[%s1836_s2 + $0x20] sm:$0xff] (!%p312_p9)  ;;  %v400_v6 = vld [vmem:[%s1836_s2 + $0x28] sm:$0xff] (!%p312_p9)  ;;  %v402_v10 = vld [vmem:[%s1836_s2 + $0x38] sm:$0xff] (!%p312_p9) }
  0x2e   : > { %s1586_s5 = scalar_lea.vmem (!%p312_p9), [#allocation2], %s1284_s29  ;;  %v1376_v11 = vld [vmem:[%s1834_s0 + $0x38] ss:$12 sps:$4 sm:$0xff] (!%p312_p9)   ;;  %v1380_v16 = vld [vmem:[%s1834_s0 + $0x50] ss:$12 sps:$4 sm:$0xff] (!%p312_p9)  }
  0x2f   : > { %v1312_v38 = vld [vmem:[%s1586_s5 + $0x4] ss:$8 sps:$4 sm:$0xff] (!%p312_p9)   ;;  %v1314_v39 = vld [vmem:[%s1586_s5] ss:$8 sps:$4 sm:$0xff] (!%p312_p9)   ;;  %v1315_v40 = vld [vmem:[%s1586_s5 + $0x14] ss:$8 sps:$4 sm:$0xff] (!%p312_p9)  }
  0x30   : > { %696 = vmatprep.subr.bf16.mxu1 (!%p312_p9), %v1312_v38  ;;  %v1317_v41 = vld [vmem:[%s1586_s5 + $0x10] ss:$8 sps:$4 sm:$0xff] (!%p312_p9)   ;;  %v1318_v42 = vld [vmem:[%s1586_s5 + $0x24] ss:$8 sps:$4 sm:$0xff] (!%p312_p9)   ;;  %v1320_v43 = vld [vmem:[%s1586_s5 + $0x20] ss:$8 sps:$4 sm:$0xff] (!%p312_p9)  }
  0x31   : > { %697 = vmatpush1.bf16.msra.mxu1 (!%p312_p9), %v1314_v39  ;;  %v1321_v44 = vld [vmem:[%s1586_s5 + $0x34] ss:$8 sps:$4 sm:$0xff] (!%p312_p9)   ;;  %v1323_v45 = vld [vmem:[%s1586_s5 + $0x30] ss:$8 sps:$4 sm:$0xff] (!%p312_p9)   ;;  %v1324_v46 = vld [vmem:[%s1586_s5 + $0x44] ss:$8 sps:$4 sm:$0xff] (!%p312_p9)   ;;  %410 = vperm.xlu0 (!%p312_p9), %1310, %v396_v63  }
  0x32   : > { %698 = vmatprep.subr.bf16.mxu1 %v1315_v40  ;;  %v1326_v47 = vld [vmem:[%s1586_s5 + $0x40] ss:$8 sps:$4 sm:$0xff]   ;;  %v1327_v48 = vld [vmem:[%s1586_s5 + $0x54] ss:$8 sps:$4 sm:$0xff]   ;;  %v1329_v49 = vld [vmem:[%s1586_s5 + $0x50] ss:$8 sps:$4 sm:$0xff]   ;;  %420 = vperm.xlu1 %1311, %v398_v1  }
  0x33   : > { %v1354_v50 = vld [vmem:[%s1586_s5 + $0x104] ss:$8 sps:$4 sm:$0xff]   ;;  %v1358_v52 = vld [vmem:[%s1586_s5 + $0x100] ss:$8 sps:$4 sm:$0xff]   ;;  %v1360_v53 = vld [vmem:[%s1586_s5 + $0x114] ss:$8 sps:$4 sm:$0xff]  }
  0x34   : > { %v1330_v51 = vld [vmem:[%s1586_s5 + $0x64] ss:$8 sps:$4 sm:$0xff]   ;;  %769 = vmatprep.subr.bf16.mxu0 %v1354_v50  ;;  %v1332_v54 = vld [vmem:[%s1586_s5 + $0x60] ss:$8 sps:$4 sm:$0xff]   ;;  %v1364_v55 = vld [vmem:[%s1586_s5 + $0x110] ss:$8 sps:$4 sm:$0xff]  }
  0x35   : > { %699 = vmatpush1.bf16.msra.mxu1 %v1317_v41  ;;  %770 = vmatpush1.bf16.msra.mxu0 %v1358_v52  ;;  %v1333_v56 = vld [vmem:[%s1586_s5 + $0x74] ss:$8 sps:$4 sm:$0xff]   ;;  %v1335_v58 = vld [vmem:[%s1586_s5 + $0x70] ss:$8 sps:$4 sm:$0xff]   ;;  %v1336_v59 = vld [vmem:[%s1586_s5 + $0x84] ss:$8 sps:$4 sm:$0xff]  }
  0x36   : > { %700 = vmatprep.subr.bf16.mxu1 %v1318_v42  ;;  %771 = vmatprep.subr.bf16.mxu0 %v1360_v53  ;;  %v1338_v62 = vld [vmem:[%s1586_s5 + $0x80] ss:$8 sps:$4 sm:$0xff]   ;;  %v1339_v0 = vld [vmem:[%s1586_s5 + $0x94] ss:$8 sps:$4 sm:$0xff]   ;;  %v1341_v3 = vld [vmem:[%s1586_s5 + $0x90] ss:$8 sps:$4 sm:$0xff]  }
  0x37   : > { %v1342_v5 = vld [vmem:[%s1586_s5 + $0xa4] ss:$8 sps:$4 sm:$0xff]   ;;  %425 = vperm.xlu0 %1310, %v399_v4   ;;  %v1344_v7 = vld [vmem:[%s1586_s5 + $0xa0] ss:$8 sps:$4 sm:$0xff]   ;;  %430 = vperm.xlu1 %1311, %v400_v6   ;;  %v1345_v9 = vld [vmem:[%s1586_s5 + $0xb4] ss:$8 sps:$4 sm:$0xff]  }
  0x38   : > { %v1347_v12 = vld [vmem:[%s1586_s5 + $0xb0] ss:$8 sps:$4 sm:$0xff]   ;;  %v1348_v13 = vld [vmem:[%s1586_s5 + $0xc4] ss:$8 sps:$4 sm:$0xff]   ;;  %v1350_v14 = vld [vmem:[%s1586_s5 + $0xc0] ss:$8 sps:$4 sm:$0xff]  }
  0x39   : > { %701 = vmatpush1.bf16.msra.mxu1 %v1320_v43  ;;  %772 = vmatpush1.bf16.msra.mxu0 %v1364_v55  ;;  %v1351_v15 = vld [vmem:[%s1586_s5 + $0xd4] ss:$8 sps:$4 sm:$0xff]   ;;  %v1353_v17 = vld [vmem:[%s1586_s5 + $0xd0] ss:$8 sps:$4 sm:$0xff]   ;;  %v1356_v18 = vld [vmem:[%s1586_s5 + $0xe4] ss:$8 sps:$4 sm:$0xff]  }
  0x3a   : > { %702 = vmatprep.subr.bf16.mxu1 %v1321_v44  ;;  %v1359_v19 = vld [vmem:[%s1586_s5 + $0xe0] ss:$8 sps:$4 sm:$0xff]   ;;  %v1362_v20 = vld [vmem:[%s1586_s5 + $0xf4] ss:$8 sps:$4 sm:$0xff]   ;;  %v1365_v21 = vld [vmem:[%s1586_s5 + $0xf0] ss:$8 sps:$4 sm:$0xff]  }
  0x3b   : > { %435 = vperm.xlu0 %1310, %v401_v8   ;;  %440 = vperm.xlu1 %1311, %v402_v10   ;;  %v1366_v22 = vld [vmem:[%s1834_s0] ss:$12 sps:$4 sm:$0xff]   ;;  %v1370_v23 = vld [vmem:[%s1834_s0 + $0x1c] ss:$12 sps:$4 sm:$0xff]   ;;  %v1373_v24 = vld [vmem:[%s1834_s0 + $0x18] ss:$12 sps:$4 sm:$0xff]  }
  0x3c   : > { %1208 = vmatmul.mubr.msk.bf16.vlgmr.msra.gmra.mrb[0].mxu0 %vm683_vm0, %v1369_v57  ;;  %v1374_v25 = vld [vmem:[%s1834_s0 + $0x34] ss:$12 sps:$4 sm:$0xff]   ;;  %v1377_v26 = vld [vmem:[%s1834_s0 + $0x30] ss:$12 sps:$4 sm:$0xff]   ;;  %v1378_v27 = vld [vmem:[%s1834_s0 + $0x4c] ss:$12 sps:$4 sm:$0xff]  }
  0x3d   : > { %703 = vmatpush1.bf16.msra.mxu1 %v1323_v45  ;;  %811 = vmatprep.mubr.bf16.mxu0 %v1438_v36  ;;  %v1381_v28 = vld [vmem:[%s1834_s0 + $0x48] ss:$12 sps:$4 sm:$0xff]   ;;  %s1250_s28 = sshll.u32 (%p1489_p5), %s1152_s15, 3 }
  0x3e   : > { %704 = vmatprep.subr.bf16.mxu1 %v1324_v46  ;;  %s1035_s10 = scalar_lea.vmem (%p1489_p5), %s1837_s3, %s1250_s28 }
  0x41   : > { %705 = vmatpush1.bf16.msra.mxu1 %v1326_v47 }
  0x42   : > { %706 = vmatprep.subr.bf16.mxu1 %v1327_v48 }
  0x44   : > { %1209 = vmatmul.mubr.msk.bf16.gmra.mrb[4].mxu0 %vm683_vm0, %v1372_v2 }
  0x45   : > { %707 = vmatpush1.bf16.msra.mxu1 %v1329_v49  ;;  %821 = vmatprep.mubr.bf16.mxu0 %v1438_v36 }
  0x46   : > { %708 = vmatprep.subr.bf16.mxu1 %v1330_v51 }
  0x49   : > { %709 = vmatpush1.bf16.msra.mxu1 %v1332_v54 }
  0x4a   : > { %710 = vmatprep.subr.bf16.mxu1 %v1333_v56 }
  0x4c   : > { %1210 = vmatmul.mubr.msk.bf16.gmra.mrb[8].mxu0 %vm683_vm0, %v1376_v11 }
  0x4d   : > { %711 = vmatpush1.bf16.msra.mxu1 %v1335_v58  ;;  %831 = vmatprep.mubr.bf16.mxu0 %v1438_v36 }
  0x4e   : > { %712 = vmatprep.subr.bf16.mxu1 %v1336_v59 }
  0x51   : > { %713 = vmatpush1.bf16.msra.mxu1 %v1338_v62 }
  0x52   : > { %714 = vmatprep.subr.bf16.mxu1 %v1339_v0 }
  0x54   : > { %1211 = vmatmul.mubr.msk.bf16.gmra.mrb[12].mxu0 %vm683_vm0, %v1380_v16 }
  0x55   : > { %715 = vmatpush1.bf16.msra.mxu1 %v1341_v3 }
  0x56   : > { %716 = vmatprep.subr.bf16.mxu1 %v1342_v5 }
  0x59   : > { %717 = vmatpush1.bf16.msra.mxu1 %v1344_v7 }
  0x5a   : > { %718 = vmatprep.subr.bf16.mxu1 %v1345_v9 }
  0x5d   : > { %719 = vmatpush1.bf16.msra.mxu1 %v1347_v12 }
  0x5e   : > { %720 = vmatprep.subr.bf16.mxu1 %v1348_v13 }
  0x61   : > { %721 = vmatpush1.bf16.msra.mxu1 %v1350_v14 }
  0x62   : > { %722 = vmatprep.subr.bf16.mxu1 %v1351_v15 }
  0x65   : > { %723 = vmatpush1.bf16.msra.mxu1 %v1353_v17 }
  0x66   : > { %724 = vmatprep.subr.bf16.mxu1 %v1356_v18 }
  0x69   : > { %725 = vmatpush1.bf16.msra.mxu1 %v1359_v19 }
  0x6a   : > { %726 = vmatprep.subr.bf16.mxu1 %v1362_v20 }
  0x6d   : > { %727 = vmatpush1.bf16.msra.mxu1 %v1365_v21 }
  0x70   : > { %729 = vmatmul.mubr.bf16.vlgmr.msra.gmra.mrb[0].mxu1 %v1366_v22 }
  0x71   : > { %738 = vmatprep.mubr.bf16.mxu1 %v1370_v23 }
  0x78   : > { %739 = vmatmul.mubr.bf16.gmra.mrb[4].mxu1 %v1373_v24 }
  0x79   : > { %748 = vmatprep.mubr.bf16.mxu1 %v1374_v25 }
  0x80   : > { %749 = vmatmul.mubr.bf16.gmra.mrb[8].mxu1 %v1377_v26 }
  0x81   : > { %758 = vmatprep.mubr.bf16.mxu1 %v1378_v27 }
  0x88   : > { %759 = vmatmul.mubr.bf16.gmra.mrb[12].mxu1 %v1381_v28 }
  0xac   : > { %v406_v45 = vpop.permute.xlu0 %405  ;;  %v416_v56 = vpop.permute.xlu1 %415 }
  0xb0   : > { %v411_v47 = vpop.permute.xlu0 %410 }
  0xb1   : > { %v421_v7 = vpop.permute.xlu1 %420 }
  0xb6   : > { %v426_v22 = vpop.permute.xlu0 %425  ;;  %v431_v28 = vpop.permute.xlu1 %430 }
 0x10f   : > { %v803_v29 = vpop.f32.mrb[0].mxu0 }
 0x110   : > { %v805_v30 = vpop.f32.mrb[1].mxu0 }
 0x111   : > { %v807_v31 = vpop.f32.mrb[2].mxu0 }
 0x112   : > { %v809_v32 = vpop.f32.mrb[3].mxu0 }
 0x117   : > { %v813_v33 = vpop.f32.mrb[4].mxu0 }
 0x118   : > { %v815_v34 = vpop.f32.mrb[5].mxu0 }
 0x119   : > { %v817_v35 = vpop.f32.mrb[6].mxu0 }
 0x11a   : > { %v819_v36 = vpop.f32.mrb[7].mxu0 }
 0x11f   : > { %v1688_v37 = vpop.f32.mrb[8].mxu0 }
 0x120   : > { %v1690_v38 = vpop.f32.mrb[9].mxu0 }
 0x121   : > { %v1692_v39 = vpop.f32.mrb[10].mxu0 }
 0x122   : > { %v1694_v40 = vpop.f32.mrb[11].mxu0 }
 0x127   : > { %v1696_v41 = vpop.f32.mrb[12].mxu0 }
 0x128   : > { %v1698_v42 = vpop.f32.mrb[13].mxu0 }
 0x129   : > { %v1700_v43 = vpop.f32.mrb[14].mxu0 }
 0x12a   : > { %v1702_v44 = vpop.f32.mrb[15].mxu0 }
 0x143   : > { %v730_v46 = vpop.f32.mrb[0].mxu1 }
 0x144   : > { %v731_v48 = vadd.f32 %v730_v46, %v406_v45  ;;  %v732_v49 = vpop.f32.mrb[1].mxu1 }
 0x145   : > { %v733_v50 = vadd.f32 %v732_v49, %v406_v45  ;;  %v734_v51 = vpop.f32.mrb[2].mxu1 }
 0x146   : > { %v1704_v52 = vadd.f32 %v803_v29, %v731_v48  ;;  %v735_v53 = vadd.f32 %v734_v51, %v411_v47  ;;  %v736_v54 = vpop.f32.mrb[3].mxu1 }
 0x147   : > { %v1706_v55 = vadd.f32 %v805_v30, %v733_v50  ;;  %v737_v57 = vadd.f32 %v736_v54, %v411_v47 }
 0x148   : > { %v858_v58 = vmin.f32 %v1704_v52, 0.0  ;;  %v1709_v59 = vadd.f32 %v807_v31, %v735_v53  ;;  %vm842_vm1 = vcmp.gt.f32.partialorder %v1704_v52, 0.0 }
 0x149   : > { %v859_v60 = vmin.f32 %v1706_v55, 0.0  ;;  %v1712_v61 = vadd.f32 %v809_v32, %v737_v57  ;;  %vm843_vm2 = vcmp.gt.f32.partialorder %v1706_v55, 0.0 }
 0x14a   : > { %v874_v62 = vmul.f32 1.442695, %v858_v58  ;;  %v860_v63 = vmin.f32 %v1709_v59, 0.0  ;;  %vm844_vm3 = vcmp.gt.f32.partialorder %v1709_v59, 0.0 }
 0x14b   : > { %v876_v0 = vmul.f32 1.442695, %v859_v60  ;;  %v861_v1 = vmin.f32 %v1712_v61, 0.0  ;;  %v740_v2 = vpop.f32.mrb[4].mxu1  ;;  %vm845_vm4 = vcmp.gt.f32.partialorder %v1712_v61, 0.0 }
 0x14c   : > { %1382 = vpow2.f32 %v874_v62  ;;  %v878_v3 = vmul.f32 1.442695, %v860_v63  ;;  %v741_v4 = vadd.f32 %v740_v2, %v416_v56  ;;  %v742_v5 = vpop.f32.mrb[5].mxu1 }
 0x14d   : > { %1384 = vpow2.f32 %v876_v0  ;;  %v880_v6 = vmul.f32 1.442695, %v861_v1  ;;  %v743_v8 = vadd.f32 %v742_v5, %v416_v56  ;;  %v744_v9 = vpop.f32.mrb[6].mxu1 }
 0x14e   : > { %1386 = vpow2.f32 %v878_v3  ;;  %v1716_v10 = vadd.f32 %v813_v33, %v741_v4  ;;  %v745_v11 = vadd.f32 %v744_v9, %v421_v7  ;;  %v746_v12 = vpop.f32.mrb[7].mxu1 }
 0x14f   : > { %1388 = vpow2.f32 %v880_v6  ;;  %v1718_v13 = vadd.f32 %v815_v34, %v743_v8  ;;  %v747_v14 = vadd.f32 %v746_v12, %v421_v7  ;;  %v436_v7 = vpop.permute.xlu0 %435 }
 0x150   : > { %v862_v15 = vmin.f32 %v1716_v10, 0.0  ;;  %v1721_v16 = vadd.f32 %v817_v35, %v745_v11  ;;  %vm846_vm5 = vcmp.gt.f32.partialorder %v1716_v10, 0.0 }
 0x151   : > { %v863_v17 = vmin.f32 %v1718_v13, 0.0  ;;  %v1724_v18 = vadd.f32 %v819_v36, %v747_v14  ;;  %vm847_vm6 = vcmp.gt.f32.partialorder %v1718_v13, 0.0 }
 0x152   : > { %v882_v19 = vmul.f32 1.442695, %v862_v15  ;;  %v864_v20 = vmin.f32 %v1721_v16, 0.0  ;;  %vm848_vm7 = vcmp.gt.f32.partialorder %v1721_v16, 0.0 }
 0x153   : > { %v884_v21 = vmul.f32 1.442695, %v863_v17  ;;  %v865_v23 = vmin.f32 %v1724_v18, 0.0  ;;  %v750_v24 = vpop.f32.mrb[8].mxu1  ;;  %vm849_vm8 = vcmp.gt.f32.partialorder %v1724_v18, 0.0 }
 0x154   : > { %1390 = vpow2.f32 %v882_v19  ;;  %v886_v25 = vmul.f32 1.442695, %v864_v20  ;;  %v751_v26 = vadd.f32 %v750_v24, %v426_v22  ;;  %v752_v27 = vpop.f32.mrb[9].mxu1 }
 0x155   : > { %1392 = vpow2.f32 %v884_v21  ;;  %v888_v29 = vmul.f32 1.442695, %v865_v23  ;;  %v753_v30 = vadd.f32 %v752_v27, %v426_v22  ;;  %v754_v31 = vpop.f32.mrb[10].mxu1 }
 0x156   : > { %v1383_v32 = vpop.eup %1382  ;;  %1394 = vpow2.f32 %v886_v25  ;;  %v1730_v33 = vadd.f32 %v1688_v37, %v751_v26  ;;  %v755_v34 = vadd.f32 %v754_v31, %v431_v28  ;;  %v756_v35 = vpop.f32.mrb[11].mxu1 }
 0x157   : > { %v1385_v36 = vpop.eup %1384  ;;  %v1212_v45 = vadd.f32 -1.0, %v1383_v32  ;;  %1396 = vpow2.f32 %v888_v29  ;;  %v1734_v46 = vadd.f32 %v1690_v38, %v753_v30  ;;  %v757_v58 = vadd.f32 %v756_v35, %v431_v28 }
 0x158   : > { %v1387_v47 = vpop.eup %1386  ;;  %v1213_v48 = vadd.f32 -1.0, %v1385_v36  ;;  %v866_v49 = vmin.f32 %v1730_v33, 0.0  ;;  %v1739_v37 = vadd.f32 %v1692_v39, %v755_v34  ;;  %vm850_vm9 = vcmp.gt.f32.partialorder %v1730_v33, 0.0 }
 0x159   : > { %v1389_v50 = vpop.eup %1388  ;;  %v922_v51 = vmul.f32 1.6732632, %v1212_v45  ;;  %v1214_v53 = vadd.f32 -1.0, %v1387_v47  ;;  %v867_v54 = vmin.f32 %v1734_v46, 0.0  ;;  %vm851_vm10 = vcmp.gt.f32.partialorder %v1734_v46, 0.0 }
 0x15a   : > { %v923_v38 = vmul.f32 1.6732632, %v1213_v48  ;;  %v1215_v56 = vadd.f32 -1.0, %v1389_v50  ;;  %v890_v57 = vmul.f32 1.442695, %v866_v49  ;;  %v868_v63 = vmin.f32 %v1739_v37, 0.0  ;;  %v441_v49 = vpop.permute.xlu1 %440 }
 0x15b   : > { %v938_v39 = vsel %vm842_vm1, %v1704_v52, %v922_v51  ;;  %v924_v60 = vmul.f32 1.6732632, %v1214_v53  ;;  %v892_v62 = vmul.f32 1.442695, %v867_v54  ;;  %v760_v0 = vpop.f32.mrb[12].mxu1  ;;  %vm852_vm11 = vcmp.gt.f32.partialorder %v1739_v37, 0.0 }
 0x15c   : > { %v954_v1 = vmul.f32 1.050701, %v938_v39  ;;  %v939_v2 = vsel %vm843_vm2, %v1706_v55, %v923_v38  ;;  %v925_v3 = vmul.f32 1.6732632, %v1215_v56  ;;  %1398 = vpow2.f32 %v890_v57  ;;  %v762_v4 = vpop.f32.mrb[13].mxu1 }
 0x15d   : > { %v955_v5 = vmul.f32 1.050701, %v939_v2  ;;  %v940_v6 = vsel %vm844_vm3, %v1709_v59, %v924_v60  ;;  %1400 = vpow2.f32 %v892_v62  ;;  %v894_v52 = vmul.f32 1.442695, %v868_v63  ;;  %v764_v8 = vpop.f32.mrb[14].mxu1 }
 0x15e   : > { %v1391_v9 = vpop.eup %1390  ;;  %v956_v11 = vmul.f32 1.050701, %v940_v6  ;;  %v941_v12 = vsel %vm845_vm4, %v1712_v61, %v925_v3  ;;  %v1762_v55 = vadd.f32 %v1694_v40, %v757_v58  ;;  %v761_v14 = vadd.f32 %v760_v0, %v436_v7  ;;  %v766_v15 = vpop.f32.mrb[15].mxu1 }
 0x15f   : > { %v1393_v17 = vpop.eup %1392  ;;  %v1242_v19 = vpack.c.bf16 %v955_v5, %v954_v1  ;;  %v957_v20 = vmul.f32 1.050701, %v941_v12  ;;  %v1216_v59 = vadd.f32 -1.0, %v1391_v9  ;;  %1402 = vpow2.f32 %v894_v52 }
 0x160   : > { %v1395_v21 = vpop.eup %1394  ;;  %v1217_v22 = vadd.f32 -1.0, %v1393_v17  ;;  %v869_v23 = vmin.f32 %v1762_v55, 0.0  ;;  %v1767_v24 = vadd.f32 %v1696_v41, %v761_v14  ;;  %v763_v27 = vadd.f32 %v762_v4, %v436_v7 }
 0x161   : > { %v1397_v61 = vpop.eup %1396  ;;  %1018 = vst [vmem:[%s1770_s12] sm:$0xff] %v1242_v19  ;;  %v1243_v40 = vpack.c.bf16 %v957_v20, %v956_v11  ;;  %v926_v25 = vmul.f32 1.6732632, %v1216_v59  ;;  %v1218_v26 = vadd.f32 -1.0, %v1395_v21  ;;  %v765_v54 = vadd.f32 %v764_v8, %v441_v49 }
 0x162   : > { %v927_v28 = vmul.f32 1.6732632, %v1217_v22  ;;  %v1219_v29 = vadd.f32 -1.0, %v1397_v61  ;;  %v896_v30 = vmul.f32 1.442695, %v869_v23  ;;  %v870_v32 = vmin.f32 %v1767_v24, 0.0 }
 0x163   : > { %1019 = vst [vmem:[%s1770_s12 + $0x8] sm:$0xff] %v1243_v40  ;;  %v942_v41 = vsel %vm846_vm5, %v1716_v10, %v926_v25  ;;  %v928_v31 = vmul.f32 1.6732632, %v1218_v26  ;;  %v1780_v34 = vadd.f32 %v1698_v42, %v763_v27  ;;  %v838_v39 = vadd.f32 %v1700_v43, %v765_v54 }
 0x164   : > { %v958_v35 = vmul.f32 1.050701, %v942_v41  ;;  %v943_v36 = vsel %vm847_vm6, %v1718_v13, %v927_v28  ;;  %v929_v45 = vmul.f32 1.6732632, %v1219_v29  ;;  %1404 = vpow2.f32 %v896_v30 }
 0x165   : > { %v959_v47 = vmul.f32 1.050701, %v943_v36  ;;  %v944_v48 = vsel %vm848_vm7, %v1721_v16, %v928_v31  ;;  %v898_v10 = vmul.f32 1.442695, %v870_v32  ;;  %v871_v53 = vmin.f32 %v1780_v34, 0.0 }
 0x166   : > { %v1399_v50 = vpop.eup %1398  ;;  %v960_v51 = vmul.f32 1.050701, %v944_v48  ;;  %v945_v42 = vsel %vm849_vm8, %v1724_v18, %v929_v45  ;;  %v767_v60 = vadd.f32 %v766_v15, %v441_v49  ;;  %v872_v3 = vmin.f32 %v838_v39, 0.0 }
 0x167   : > { %v1401_v38 = vpop.eup %1400  ;;  %v1244_v56 = vpack.c.bf16 %v959_v47, %v958_v35  ;;  %v961_v13 = vmul.f32 1.050701, %v945_v42  ;;  %v1220_v57 = vadd.f32 -1.0, %v1399_v50  ;;  %1406 = vpow2.f32 %v898_v10 }
 0x168   : > { %v1221_v58 = vadd.f32 -1.0, %v1401_v38  ;;  %v900_v16 = vmul.f32 1.442695, %v871_v53  ;;  %v840_v4 = vadd.f32 %v1702_v44, %v767_v60  ;;  %v902_v52 = vmul.f32 1.442695, %v872_v3 }
 0x169   : > { %v1403_v62 = vpop.eup %1402  ;;  %1020 = vst [vmem:[%s1770_s12 + $0x10] sm:$0xff] %v1244_v56  ;;  %v1245_v63 = vpack.c.bf16 %v961_v13, %v960_v51  ;;  %v930_v0 = vmul.f32 1.6732632, %v1220_v57  ;;  %vm853_vm12 = vcmp.gt.f32.partialorder %v1762_v55, 0.0  ;;  %vm854_vm13 = vcmp.gt.f32.partialorder %v1767_v24, 0.0 }
 0x16a   : > { %v931_v18 = vmul.f32 1.6732632, %v1221_v58  ;;  %v1222_v1 = vadd.f32 -1.0, %v1403_v62  ;;  %1408 = vpow2.f32 %v900_v16  ;;  %v873_v8 = vmin.f32 %v840_v4, 0.0  ;;  %v1079_v47 = vld [vmem:[%s1770_s12 + $0x8] sm:$0xff] (%p1489_p5) }
 0x16b   : > { %1021 = vst [vmem:[%s1770_s12 + $0x18] sm:$0xff] %v1245_v63  ;;  %v946_v2 = vsel %vm850_vm9, %v1730_v33, %v930_v0  ;;  %1410 = vpow2.f32 %v902_v52  ;;  %vm855_vm14 = vcmp.gt.f32.partialorder %v1780_v34, 0.0  ;;  %vm856_vm15 = vcmp.gt.f32.partialorder %v838_v39, 0.0  ;;  %1080 = vst [vmem:[%s1035_s10 + $0x10] sm:$0xff] (%p1489_p5), %v1079_v47 }
 0x16c   : > { %v962_v43 = vmul.f32 1.050701, %v946_v2  ;;  %v947_v5 = vsel %vm851_vm10, %v1734_v46, %v931_v18  ;;  %v932_v6 = vmul.f32 1.6732632, %v1222_v1  ;;  %v904_v14 = vmul.f32 1.442695, %v873_v8 }
 0x16d   : > { %v963_v7 = vmul.f32 1.050701, %v947_v5  ;;  %vm857_vm0 = vcmp.gt.f32.partialorder %v840_v4, 0.0 }
 0x16e   : > { %v1405_v9 = vpop.eup %1404  ;;  %v948_v12 = vsel %vm852_vm11, %v1739_v37, %v932_v6  ;;  %1412 = vpow2.f32 %v904_v14 }
 0x16f   : > { %v1246_v11 = vpack.c.bf16 %v963_v7, %v962_v43  ;;  %v1223_v33 = vadd.f32 -1.0, %v1405_v9  ;;  %v964_v17 = vmul.f32 1.050701, %v948_v12 }
 0x170   : > { %v1081_v48 = vld [vmem:[%s1770_s12 + $0x10] sm:$0xff] (%p1489_p5) }
 0x171   : > { %v1407_v15 = vpop.eup %1406  ;;  %1022 = vst [vmem:[%s1770_s12 + $0x20] sm:$0xff] %v1246_v11  ;;  %v933_v44 = vmul.f32 1.6732632, %v1223_v33  ;;  %1082 = vst [vmem:[%s1035_s10 + $0x20] sm:$0xff] (%p1489_p5), %v1081_v48 }
 0x172   : > { %v1224_v46 = vadd.f32 -1.0, %v1407_v15  ;;  %v1083_v49 = vld [vmem:[%s1770_s12 + $0x18] sm:$0xff] (%p1489_p5) }
 0x173   : > { %v949_v19 = vsel %vm853_vm12, %v1762_v55, %v933_v44  ;;  %1084 = vst [vmem:[%s1035_s10 + $0x30] sm:$0xff] (%p1489_p5), %v1083_v49 }
 0x174   : > { %v1409_v20 = vpop.eup %1408  ;;  %v965_v59 = vmul.f32 1.050701, %v949_v19  ;;  %v934_v21 = vmul.f32 1.6732632, %v1224_v46 }
 0x175   : > { %v1225_v37 = vadd.f32 -1.0, %v1409_v20  ;;  %v1411_v25 = vpop.eup %1410 }
 0x176   : > { %v1247_v22 = vpack.c.bf16 %v965_v59, %v964_v17  ;;  %v950_v23 = vsel %vm854_vm13, %v1767_v24, %v934_v21  ;;  %v1226_v27 = vadd.f32 -1.0, %v1411_v25 }
 0x177   : > { %v935_v61 = vmul.f32 1.6732632, %v1225_v37  ;;  %v966_v40 = vmul.f32 1.050701, %v950_v23 }
 0x178   : > { %1023 = vst [vmem:[%s1770_s12 + $0x28] sm:$0xff] %v1247_v22  ;;  %v1413_v28 = vpop.eup %1412  ;;  %v936_v30 = vmul.f32 1.6732632, %v1226_v27  ;;  %v1085_v10 = vld [vmem:[%s1770_s12 + $0x20] sm:$0xff] (%p1489_p5) }
 0x179   : > { %v951_v26 = vsel %vm855_vm14, %v1780_v34, %v935_v61  ;;  %v1227_v41 = vadd.f32 -1.0, %v1413_v28  ;;  %v1077_v34 = vld [vmem:[%s1770_s12] sm:$0xff] (%p1489_p5)  ;;  %1086 = vst [vmem:[%s1035_s10 + $0x40] sm:$0xff] (%p1489_p5), %v1085_v10 }
 0x17a   : > { %v967_v55 = vmul.f32 1.050701, %v951_v26  ;;  %v952_v31 = vsel %vm856_vm15, %v838_v39, %v936_v30  ;;  %1078 = vst [vmem:[%s1035_s10] sm:$0xff] (%p1489_p5), %v1077_v34 }
 0x17b   : > { %v937_v32 = vmul.f32 1.6732632, %v1227_v41  ;;  %v968_v24 = vmul.f32 1.050701, %v952_v31 }
 0x17c   : > { %v1248_v29 = vpack.c.bf16 %v967_v55, %v966_v40  ;;  %1032 = sbr.rel (!%p1489_p5) target bundleno = 395 (0x18b), region = 74 }
 0x17d   : > { %v953_v35 = vsel %vm857_vm0, %v840_v4, %v937_v32 }
 0x17e   : > { %1024 = vst [vmem:[%s1770_s12 + $0x30] sm:$0xff] %v1248_v29  ;;  %v969_v36 = vmul.f32 1.050701, %v953_v35 }
 0x17f   : > { %v1087_v50 = vld [vmem:[%s1770_s12 + $0x28] sm:$0xff] (%p1489_p5) }
 0x180   : > { %v1249_v45 = vpack.c.bf16 %v969_v36, %v968_v24  ;;  %1088 = vst [vmem:[%s1035_s10 + $0x50] sm:$0xff] (%p1489_p5), %v1087_v50 }
 0x182   : > { %1025 = vst [vmem:[%s1770_s12 + $0x38] sm:$0xff] %v1249_v45 }
 0x185   : > { %v1089_v51 = vld [vmem:[%s1770_s12 + $0x30] sm:$0xff] }
 0x186   : > { %1090 = vst [vmem:[%s1035_s10 + $0x60] sm:$0xff] %v1089_v51 }
 0x189   : > { %v1091_v42 = vld [vmem:[%s1770_s12 + $0x38] sm:$0xff] }
 0x18a   : > { %1092 = vst [vmem:[%s1035_s10 + $0x70] sm:$0xff] %v1091_v42 }
 0x18b PF: > { %p10_p10 = scmp.ge.s32.totalorder %s1476_s16, 4   ;;  %s1839_s12 = smov %s1432_s13 }
 0x18c   : > { %s1840_s13 = smov %s1487_s19  ;;  %s1841_s14 = smov %s1476_s16 }
 0x18d   :  { %12 = sbr.rel (!%p10_p10) target bundleno = 2 (0x2), region = 143 }

// kernel: cnn_forward.7
= control target key start
LH: loop header
LB: loop body
LE: loop exit
PB: predicated region body
PF: predicated region fallthrough
CT: control target
= control target key end

     0   :  { %8 = vsyncpa [#allocation3], 0  ;;  %s2236_s12 = smov 0   ;;  %s2442_s0 = inlined_call_operand.vmem [shape: bf16[2,16384], index: 0, kind: input, shape index: {}]   ;;  %s2443_s1 = inlined_call_operand.vmem [shape: bf16[16384,10], index: 1, kind: input, shape index: {}]   ;;  %s2444_s2 = inlined_call_operand.vmem [shape: f32[1,10], index: 2, kind: input, shape index: {}]   ;;  %s2445_s3 = inlined_call_operand.hbm [shape: f32[2,10], index: 3, kind: output, shape index: {}]  }
   0x1 LB: > { %s2242_s13 = sadd.s32 4294967295, %s2212_s12   ;;  %p1716_p0 = scmp.ge.s32.totalorder %s2212_s12, 1  ;;  %s2212_s12 = sphi %s2236_s12, %s14_s12  }
   0x2   : > { %p144_p1 = scmp.lt.s32.totalorder %s2212_s12, 9 }
   0x4   : > { %p145_p2 = pnand %p1716_p0, %p144_p1 }
   0x5   : > { %s1717_s14 = sshll.u32 (!%p145_p2), %s2242_s13, 4  ;;  %s1718_s15 = sshll.u32 (!%p145_p2), %s2242_s13, 8 }
   0x6   : > { %148 = sbr.rel (%p145_p2) target bundleno = 388 (0x184), region = 32  ;;  %p168_p3 = scmp.lt.s32.totalorder (!%p145_p2), %s1717_s14, 127 }
   0x7   : > { %p173_p4 = scmp.lt.s32.totalorder (!%p145_p2), %s1718_s15, 2047  ;;  %p1720_p5 = scmp.ne.s32.totalorder (!%p145_p2), %s2242_s13, 0 }
   0xd   : > { %s2447_s14 = smov (!%p168_p3, %s1717_s14), 127  ;;  %s2449_s15 = smov (!%p173_p4, %s1718_s15), 2047 }
   0xe   : > { %s2251_s18 = scalar_lea.vmem %s2442_s0, %s2447_s14  ;;  %s1719_s19 = sshll.u32 %s2449_s15, 2  ;;  %v1721_v0 = vld [vmem:[%s2444_s2] ss:$0 sm:$0xff] (!%p1720_p5)  ;;  %vm190_vm0 = vcmask (!%p1720_p5), 74752  }
   0xf   : > { %s2256_s22 = scalar_lea.vmem %s2443_s1, %s1719_s19  ;;  %182 = sbr.rel (%p1720_p5) target bundleno = 22 (0x16), region = 36  ;;  %191 = vst.msk [vmem:[#allocation2] sm:$0x3] (!%p1720_p5), %vm190_vm0, %v1721_v0 }
  0x16 PF: > { %v2046_v1 = vld [vmem:[%s2256_s22 + $0x40] sm:$0xff]   ;;  %v2050_v5 = vld [vmem:[%s2256_s22 + $0x48] sm:$0xff]   ;;  %v2054_v9 = vld [vmem:[%s2256_s22 + $0x50] sm:$0xff]   ;;  %v457_v29 = vlaneseq  ;;  %v2214_v37 = vmov 1966171168   ;;  %s2215_s25 = smov [#allocation2]  }
  0x17   : > { %v2047_v2 = vld [vmem:[%s2256_s22 + $0xc0] sm:$0xff]   ;;  %1854 = vmatprep.subr.bf16.mxu0 %v2046_v1  ;;  %v2051_v6 = vld [vmem:[%s2256_s22 + $0xc8] sm:$0xff]   ;;  %v2055_v10 = vld [vmem:[%s2256_s22 + $0xd0] sm:$0xff]   ;;  %v455_v38 = vunpack.c.l.s4 %v2214_v37  ;;  %s1665_s26 = sshll.u32 %s2215_s25, 4  ;;  %vm1656_vm1 = vcmask 74752   ;;  %p2034_p6 = scmp.eq.s32.totalorder %s2242_s13, 7  ;;  %s1666_s26 = int_to_ptr.vmem [resolvable:$true] %s1665_s26 }
  0x18   : > { %v2048_v3 = vld [vmem:[%s2256_s22] sm:$0xff]   ;;  %1876 = vmatprep.subr.bf16.mxu1 %v2047_v2  ;;  %v2052_v7 = vld [vmem:[%s2256_s22 + $0x8] sm:$0xff]   ;;  %v2056_v11 = vld [vmem:[%s2256_s22 + $0x10] sm:$0xff]   ;;  %v458_v34 = vshrl.u32 %v457_v29, 7  ;;  %s2176_s27 = scalar_lea.vmem %s1666_s26, 32  ;;  %p2183_p10 = scmp.lt.s32.totalorder %s1666_s26, %s1666_s26 }
  0x19   : > { %v2049_v4 = vld [vmem:[%s2256_s22 + $0x80] sm:$0xff]   ;;  %1855 = vmatpush3.bf16.msra.mxu0 %v2048_v3  ;;  %v2053_v8 = vld [vmem:[%s2256_s22 + $0x88] sm:$0xff]   ;;  %v2057_v12 = vld [vmem:[%s2256_s22 + $0x90] sm:$0xff]   ;;  %v456_v41 = vunpack.c.0.s8 %v455_v38  ;;  %p2177_p7 = scmp.ne.s32.totalorder %s1666_s26, %s2176_s27  ;;  %p2184_p11 = scmp.lt.s32.totalorder %s2176_s27, %s2176_s27 }
  0x1a   : > { %1877 = vmatpush3.bf16.msra.mxu1 %v2049_v4  ;;  %1856 = vmatprep.subr.bf16.mxu0 %v2050_v5  ;;  %v2058_v13 = vld [vmem:[%s2256_s22 + $0x58] sm:$0xff]   ;;  %v2062_v17 = vld [vmem:[%s2256_s22 + $0x60] sm:$0xff]   ;;  %v2066_v21 = vld [vmem:[%s2256_s22 + $0x68] sm:$0xff]  }
  0x1b   : > { %1878 = vmatprep.subr.bf16.mxu1 %v2051_v6  ;;  %v2059_v14 = vld [vmem:[%s2256_s22 + $0xd8] sm:$0xff]   ;;  %v2063_v18 = vld [vmem:[%s2256_s22 + $0xe0] sm:$0xff]   ;;  %v2067_v22 = vld [vmem:[%s2256_s22 + $0xe8] sm:$0xff]   ;;  %v2297_v42 = vsub.s32 %v456_v41, %v458_v34  ;;  %p2178_p8 = pnand %p2177_p7, %p2034_p6  ;;  %p2185_p12 = por %p2184_p11, %p2183_p10 }
  0x1c   : > { %v2060_v15 = vld [vmem:[%s2256_s22 + $0x18] sm:$0xff]   ;;  %v2064_v19 = vld [vmem:[%s2256_s22 + $0x20] sm:$0xff]   ;;  %v2068_v23 = vld [vmem:[%s2256_s22 + $0x28] sm:$0xff]  }
  0x1d   : > { %1857 = vmatpush3.bf16.msra.mxu0 %v2052_v7  ;;  %v2061_v16 = vld [vmem:[%s2256_s22 + $0x98] sm:$0xff]   ;;  %v2065_v20 = vld [vmem:[%s2256_s22 + $0xa0] sm:$0xff]   ;;  %v2069_v24 = vld [vmem:[%s2256_s22 + $0xa8] sm:$0xff]   ;;  %p2179_p9 = pneg %p2178_p8 }
  0x1e   : > { %1879 = vmatpush3.bf16.msra.mxu1 %v2053_v8  ;;  %1858 = vmatprep.subr.bf16.mxu0 %v2054_v9  ;;  %v2070_v25 = vld [vmem:[%s2256_s22 + $0x70] sm:$0xff]   ;;  %v2074_v30 = vld [vmem:[%s2256_s22 + $0x78] sm:$0xff]   ;;  %v193_v35 = vld [vmem:[%s2251_s18] sm:$0xff] }
  0x1f   : > { %1880 = vmatprep.subr.bf16.mxu1 %v2055_v10  ;;  %v2071_v26 = vld [vmem:[%s2256_s22 + $0xf0] sm:$0xff]   ;;  %v2075_v31 = vld [vmem:[%s2256_s22 + $0xf8] sm:$0xff]   ;;  %v2079_v36 = vld [vmem:[%s2256_s22 + $0x140] sm:$0xff]   ;;  %v453_v40 = vcombine.high %v193_v35, %v193_v35  ;;  %v460_v43 = vrot.slane %v193_v35, %v2297_v42  ;;  %p2186_p13 = pnand %p2185_p12, %p2179_p9 }
  0x20   : > { %v2072_v27 = vld [vmem:[%s2256_s22 + $0x30] sm:$0xff]   ;;  %v2076_v32 = vld [vmem:[%s2256_s22 + $0x38] sm:$0xff]   ;;  %v2080_v39 = vld [vmem:[%s2256_s22 + $0x1c0] sm:$0xff]  }
  0x21   : > { %1859 = vmatpush3.bf16.msra.mxu0 %v2056_v11  ;;  %v2073_v28 = vld [vmem:[%s2256_s22 + $0xb0] sm:$0xff]   ;;  %v2077_v33 = vld [vmem:[%s2256_s22 + $0xb8] sm:$0xff]   ;;  %v2301_v44 = vrot.slane %v453_v40, %v2297_v42  ;;  %v468_v45 = vcombine.high %v460_v43, %v460_v43  ;;  %v476_v46 = vrot.slane %v460_v43, %v2297_v42  ;;  %v2081_v49 = vld [vmem:[%s2256_s22 + $0x100] sm:$0xff]  }
  0x22   : > { %1881 = vmatpush3.bf16.msra.mxu1 %v2057_v12  ;;  %1860 = vmatprep.subr.bf16.mxu0 %v2058_v13  ;;  %v2083_v52 = vld [vmem:[%s2256_s22 + $0x148] sm:$0xff]   ;;  %v2082_v54 = vld [vmem:[%s2256_s22 + $0x180] sm:$0xff]   ;;  %v2087_v58 = vld [vmem:[%s2256_s22 + $0x150] sm:$0xff]  }
  0x23   : > { %1882 = vmatprep.subr.bf16.mxu1 %v2059_v14  ;;  %v469_v47 = vcombine.high %v2301_v44, %v2301_v44  ;;  %v490_v48 = vrot.slane %v468_v45, %v2297_v42  ;;  %v498_v51 = vcombine.high %v476_v46, %v476_v46  ;;  %v2084_v55 = vld [vmem:[%s2256_s22 + $0x1c8] sm:$0xff]   ;;  %v2088_v60 = vld [vmem:[%s2256_s22 + $0x1d0] sm:$0xff]   ;;  %v2091_v62 = vld [vmem:[%s2256_s22 + $0x158] sm:$0xff]  }
  0x24   : > { %v2085_v57 = vld [vmem:[%s2256_s22 + $0x108] sm:$0xff]   ;;  %v2089_v61 = vld [vmem:[%s2256_s22 + $0x110] sm:$0xff]   ;;  %v2092_v0 = vld [vmem:[%s2256_s22 + $0x1d8] sm:$0xff]  }
  0x25   : > { %1861 = vmatpush3.bf16.msra.mxu0 %v2060_v15  ;;  %v497_v50 = vrot.slane %v469_v47, %v2297_v42  ;;  %1367 = vmatprep.mubr.bf16.mxu0 %v490_v48  ;;  %v500_v53 = vcombine.high %v490_v48, %v490_v48  ;;  %v2086_v59 = vld [vmem:[%s2256_s22 + $0x188] sm:$0xff]   ;;  %v2090_v63 = vld [vmem:[%s2256_s22 + $0x190] sm:$0xff]   ;;  %v2093_v1 = vld [vmem:[%s2256_s22 + $0x118] sm:$0xff]  }
  0x26   : > { %1883 = vmatpush3.bf16.msra.mxu1 %v2061_v16  ;;  %1862 = vmatprep.subr.bf16.mxu0 %v2062_v17  ;;  %v2095_v2 = vld [vmem:[%s2256_s22 + $0x160] sm:$0xff]   ;;  %v2094_v3 = vld [vmem:[%s2256_s22 + $0x198] sm:$0xff]   ;;  %v2099_v6 = vld [vmem:[%s2256_s22 + $0x168] sm:$0xff]  }
  0x27   : > { %1884 = vmatprep.subr.bf16.mxu1 %v2063_v18  ;;  %v501_v56 = vcombine.high %v497_v50, %v497_v50  ;;  %1407 = vmatprep.mubr.bf16.mxu1 %v500_v53  ;;  %v2096_v4 = vld [vmem:[%s2256_s22 + $0x1e0] sm:$0xff]   ;;  %v2100_v8 = vld [vmem:[%s2256_s22 + $0x1e8] sm:$0xff]   ;;  %v2103_v10 = vld [vmem:[%s2256_s22 + $0x170] sm:$0xff]   ;;  %v483_v18 = vrot.slane %v2301_v44, %v2297_v42 }
  0x28   : > { %v2097_v5 = vld [vmem:[%s2256_s22 + $0x120] sm:$0xff]   ;;  %v2101_v9 = vld [vmem:[%s2256_s22 + $0x128] sm:$0xff]   ;;  %v2104_v12 = vld [vmem:[%s2256_s22 + $0x1f0] sm:$0xff]  }
  0x29   : > { %1863 = vmatpush3.bf16.msra.mxu0 %v2064_v19  ;;  %v2098_v7 = vld [vmem:[%s2256_s22 + $0x1a0] sm:$0xff]   ;;  %v2102_v11 = vld [vmem:[%s2256_s22 + $0x1a8] sm:$0xff]   ;;  %v2105_v13 = vld [vmem:[%s2256_s22 + $0x130] sm:$0xff]  }
  0x2a   : > { %1885 = vmatpush3.bf16.msra.mxu1 %v2065_v20  ;;  %1864 = vmatprep.subr.bf16.mxu0 %v2066_v21  ;;  %v2107_v14 = vld [vmem:[%s2256_s22 + $0x178] sm:$0xff]   ;;  %v2106_v15 = vld [vmem:[%s2256_s22 + $0x1b0] sm:$0xff]   ;;  %v2111_v19 = vld [vmem:[%s2256_s22 + $0x240] sm:$0xff]  }
  0x2b   : > { %1886 = vmatprep.subr.bf16.mxu1 %v2067_v22  ;;  %v2108_v16 = vld [vmem:[%s2256_s22 + $0x1f8] sm:$0xff]   ;;  %v2112_v21 = vld [vmem:[%s2256_s22 + $0x2c0] sm:$0xff]   ;;  %v2118_v29 = vld [vmem:[%s2256_s22 + $0x288] sm:$0xff]  }
  0x2c   : > { %v2109_v17 = vld [vmem:[%s2256_s22 + $0x138] sm:$0xff]   ;;  %v2113_v22 = vld [vmem:[%s2256_s22 + $0x200] sm:$0xff]   ;;  %v2131_v40 = vld [vmem:[%s2256_s22 + $0x268] sm:$0xff]  }
  0x2d   : > { %1865 = vmatpush3.bf16.msra.mxu0 %v2068_v23  ;;  %v2110_v20 = vld [vmem:[%s2256_s22 + $0x1b8] sm:$0xff]   ;;  %v499_v23 = vcombine.high %v483_v18, %v483_v18  ;;  %v2128_v38 = vld [vmem:[%s2256_s22 + $0x2e0] sm:$0xff]   ;;  %v2132_v43 = vld [vmem:[%s2256_s22 + $0x2e8] sm:$0xff]  }
  0x2e   : > { %1887 = vmatpush3.bf16.msra.mxu1 %v2069_v24  ;;  %1866 = vmatprep.subr.bf16.mxu0 %v2070_v25  ;;  %v2115_v24 = vld [vmem:[%s2256_s22 + $0x248] sm:$0xff]   ;;  %v2114_v25 = vld [vmem:[%s2256_s22 + $0x280] sm:$0xff]   ;;  %v2124_v34 = vld [vmem:[%s2256_s22 + $0x2d8] sm:$0xff]  }
  0x2f   : > { %1888 = vmatprep.subr.bf16.mxu1 %v2071_v26  ;;  %v2116_v26 = vld [vmem:[%s2256_s22 + $0x2c8] sm:$0xff]   ;;  %v2125_v35 = vld [vmem:[%s2256_s22 + $0x218] sm:$0xff]   ;;  %v2130_v41 = vld [vmem:[%s2256_s22 + $0x2a0] sm:$0xff]  }
  0x30   : > { %v2126_v37 = vld [vmem:[%s2256_s22 + $0x298] sm:$0xff]   ;;  %v2133_v44 = vld [vmem:[%s2256_s22 + $0x228] sm:$0xff]   ;;  %v2135_v45 = vld [vmem:[%s2256_s22 + $0x270] sm:$0xff]  }
  0x31   : > { %1867 = vmatpush3.bf16.msra.mxu0 %v2072_v27  ;;  %v2117_v27 = vld [vmem:[%s2256_s22 + $0x208] sm:$0xff]  }
  0x32   : > { %1889 = vmatpush3.bf16.msra.mxu1 %v2073_v28  ;;  %1868 = vmatprep.subr.bf16.mxu0 %v2074_v30  ;;  %v2119_v28 = vld [vmem:[%s2256_s22 + $0x250] sm:$0xff]   ;;  %v2134_v47 = vld [vmem:[%s2256_s22 + $0x2a8] sm:$0xff]  }
  0x33   : > { %1890 = vmatprep.subr.bf16.mxu1 %v2075_v31  ;;  %v2120_v30 = vld [vmem:[%s2256_s22 + $0x2d0] sm:$0xff]  }
  0x34   : > { %v2121_v31 = vld [vmem:[%s2256_s22 + $0x210] sm:$0xff]  }
  0x35   : > { %1869 = vmatpush3.bf16.msra.mxu0 %v2076_v32  ;;  %v2123_v32 = vld [vmem:[%s2256_s22 + $0x258] sm:$0xff]  }
  0x36   : > { %1891 = vmatpush3.bf16.msra.mxu1 %v2077_v33  ;;  %1898 = vmatprep.subr.bf16.mxu0 %v2079_v36  ;;  %v2122_v33 = vld [vmem:[%s2256_s22 + $0x290] sm:$0xff]   ;;  %v2127_v36 = vld [vmem:[%s2256_s22 + $0x260] sm:$0xff]  }
  0x37   : > { %1920 = vmatprep.subr.bf16.mxu1 %v2080_v39  ;;  %v2129_v39 = vld [vmem:[%s2256_s22 + $0x220] sm:$0xff]  }
  0x38   : > { %1368 = vmatmul.mubr.bf16.vlgmr.msra.gmra.mrb[0].mxu0 %v476_v46  ;;  %v194_v46 = vld [vmem:[%s2251_s18 + $0x8] sm:$0xff] }
  0x39   : > { %1899 = vmatpush3.bf16.msra.mxu0 %v2081_v49  ;;  %1408 = vmatmul.mubr.bf16.vlgmr.msra.gmra.mrb[0].mxu1 %v498_v51  ;;  %v509_v48 = vrot.slane %v194_v46, %v2297_v42  ;;  %v502_v49 = vcombine.high %v194_v46, %v194_v46  ;;  %v2137_v51 = vld [vmem:[%s2256_s22 + $0x230] sm:$0xff]  }
  0x3a   : > { %1900 = vmatprep.subr.bf16.mxu0 %v2083_v52  ;;  %1921 = vmatpush3.bf16.msra.mxu1 %v2082_v54  ;;  %v2139_v54 = vld [vmem:[%s2256_s22 + $0x278] sm:$0xff]  }
  0x3b   : > { %1447 = vmatprep.mubr.bf16.mxu0 %v497_v50  ;;  %1922 = vmatprep.subr.bf16.mxu1 %v2084_v55  ;;  %v2136_v50 = vld [vmem:[%s2256_s22 + $0x2f0] sm:$0xff]   ;;  %v517_v52 = vcombine.high %v509_v48, %v509_v48  ;;  %v2370_v53 = vrot.slane %v502_v49, %v2297_v42 }
  0x3c   : > { %1487 = vmatprep.mubr.bf16.mxu1 %v501_v56  ;;  %v2138_v55 = vld [vmem:[%s2256_s22 + $0x2b0] sm:$0xff]  }
  0x3d   : > { %1901 = vmatpush3.bf16.msra.mxu0 %v2085_v57  ;;  %v539_v56 = vrot.slane %v517_v52, %v2297_v42  ;;  %v518_v57 = vcombine.high %v2370_v53, %v2370_v53 }
  0x3e   : > { %1902 = vmatprep.subr.bf16.mxu0 %v2087_v58  ;;  %1923 = vmatpush3.bf16.msra.mxu1 %v2086_v59  ;;  %v2140_v58 = vld [vmem:[%s2256_s22 + $0x2f8] sm:$0xff]  }
  0x3f   : > { %1924 = vmatprep.subr.bf16.mxu1 %v2088_v60  ;;  %v2141_v59 = vld [vmem:[%s2256_s22 + $0x238] sm:$0xff]   ;;  %v549_v60 = vcombine.high %v539_v56, %v539_v56 }
  0x41   : > { %1903 = vmatpush3.bf16.msra.mxu0 %v2089_v61  ;;  %v525_v61 = vrot.slane %v509_v48, %v2297_v42 }
  0x42   : > { %1904 = vmatprep.subr.bf16.mxu0 %v2091_v62  ;;  %1925 = vmatpush3.bf16.msra.mxu1 %v2090_v63  ;;  %v2143_v62 = vld [vmem:[%s2256_s22 + $0x340] sm:$0xff]   ;;  %v2142_v63 = vld [vmem:[%s2256_s22 + $0x2b8] sm:$0xff]  }
  0x43   : > { %1926 = vmatprep.subr.bf16.mxu1 %v2092_v0  ;;  %v546_v0 = vrot.slane %v518_v57, %v2297_v42 }
  0x45   : > { %1905 = vmatpush3.bf16.msra.mxu0 %v2093_v1  ;;  %v2144_v1 = vld [vmem:[%s2256_s22 + $0x3c0] sm:$0xff]  }
  0x46   : > { %1906 = vmatprep.subr.bf16.mxu0 %v2095_v2  ;;  %1927 = vmatpush3.bf16.msra.mxu1 %v2094_v3  ;;  %v2145_v2 = vld [vmem:[%s2256_s22 + $0x300] sm:$0xff]   ;;  %v547_v3 = vcombine.high %v525_v61, %v525_v61 }
  0x47   : > { %1928 = vmatprep.subr.bf16.mxu1 %v2096_v4  ;;  %v2147_v4 = vld [vmem:[%s2256_s22 + $0x348] sm:$0xff]  }
  0x49   : > { %1907 = vmatpush3.bf16.msra.mxu0 %v2097_v5  ;;  %v2146_v5 = vld [vmem:[%s2256_s22 + $0x380] sm:$0xff]  }
  0x4a   : > { %1908 = vmatprep.subr.bf16.mxu0 %v2099_v6  ;;  %1929 = vmatpush3.bf16.msra.mxu1 %v2098_v7  ;;  %v550_v6 = vcombine.high %v546_v0, %v546_v0  ;;  %v2148_v7 = vld [vmem:[%s2256_s22 + $0x3c8] sm:$0xff]  }
  0x4b   : > { %1930 = vmatprep.subr.bf16.mxu1 %v2100_v8  ;;  %v2149_v8 = vld [vmem:[%s2256_s22 + $0x308] sm:$0xff]  }
  0x4d   : > { %1909 = vmatpush3.bf16.msra.mxu0 %v2101_v9  ;;  %v2151_v9 = vld [vmem:[%s2256_s22 + $0x350] sm:$0xff]  }
  0x4e   : > { %1910 = vmatprep.subr.bf16.mxu0 %v2103_v10  ;;  %1931 = vmatpush3.bf16.msra.mxu1 %v2102_v11  ;;  %v2150_v10 = vld [vmem:[%s2256_s22 + $0x388] sm:$0xff]   ;;  %v2152_v11 = vld [vmem:[%s2256_s22 + $0x3d0] sm:$0xff]  }
  0x4f   : > { %1932 = vmatprep.subr.bf16.mxu1 %v2104_v12  ;;  %v2153_v12 = vld [vmem:[%s2256_s22 + $0x310] sm:$0xff]  }
  0x51   : > { %1911 = vmatpush3.bf16.msra.mxu0 %v2105_v13  ;;  %v2155_v13 = vld [vmem:[%s2256_s22 + $0x358] sm:$0xff]  }
  0x52   : > { %1912 = vmatprep.subr.bf16.mxu0 %v2107_v14  ;;  %1933 = vmatpush3.bf16.msra.mxu1 %v2106_v15  ;;  %v2154_v14 = vld [vmem:[%s2256_s22 + $0x390] sm:$0xff]   ;;  %v2156_v15 = vld [vmem:[%s2256_s22 + $0x3d8] sm:$0xff]  }
  0x53   : > { %1934 = vmatprep.subr.bf16.mxu1 %v2108_v16  ;;  %v2157_v16 = vld [vmem:[%s2256_s22 + $0x318] sm:$0xff]  }
  0x55   : > { %1913 = vmatpush3.bf16.msra.mxu0 %v2109_v17  ;;  %v2159_v17 = vld [vmem:[%s2256_s22 + $0x360] sm:$0xff]  }
  0x56   : > { %1942 = vmatprep.subr.bf16.mxu0 %v2111_v19  ;;  %1935 = vmatpush3.bf16.msra.mxu1 %v2110_v20  ;;  %v2160_v19 = vld [vmem:[%s2256_s22 + $0x3e0] sm:$0xff]  }
  0x57   : > { %1964 = vmatprep.subr.bf16.mxu1 %v2112_v21  ;;  %v2161_v20 = vld [vmem:[%s2256_s22 + $0x320] sm:$0xff]   ;;  %v2163_v21 = vld [vmem:[%s2256_s22 + $0x368] sm:$0xff]  }
  0x58   : > { %1448 = vmatmul.mubr.bf16.vlgmr.msra.gmra.mrb[4].mxu0 %v483_v18  ;;  %v2158_v18 = vld [vmem:[%s2256_s22 + $0x398] sm:$0xff]  }
  0x59   : > { %1943 = vmatpush3.bf16.msra.mxu0 %v2113_v22  ;;  %1488 = vmatmul.mubr.bf16.vlgmr.msra.gmra.mrb[4].mxu1 %v499_v23  ;;  %v2162_v22 = vld [vmem:[%s2256_s22 + $0x3a0] sm:$0xff]   ;;  %v2164_v23 = vld [vmem:[%s2256_s22 + $0x3e8] sm:$0xff]  }
  0x5a   : > { %1944 = vmatprep.subr.bf16.mxu0 %v2115_v24  ;;  %1965 = vmatpush3.bf16.msra.mxu1 %v2114_v25  ;;  %v2165_v24 = vld [vmem:[%s2256_s22 + $0x328] sm:$0xff]   ;;  %v2167_v25 = vld [vmem:[%s2256_s22 + $0x370] sm:$0xff]  }
  0x5b   : > { %1966 = vmatprep.subr.bf16.mxu1 %v2116_v26  ;;  %1527 = vmatprep.mubr.bf16.mxu0 %v539_v56  ;;  %v2166_v26 = vld [vmem:[%s2256_s22 + $0x3a8] sm:$0xff]  }
  0x5c   : > { %1567 = vmatprep.mubr.bf16.mxu1 %v549_v60 }
  0x5d   : > { %1945 = vmatpush3.bf16.msra.mxu0 %v2117_v27  ;;  %v2168_v27 = vld [vmem:[%s2256_s22 + $0x3f0] sm:$0xff]  }
  0x5e   : > { %1946 = vmatprep.subr.bf16.mxu0 %v2119_v28  ;;  %1967 = vmatpush3.bf16.msra.mxu1 %v2118_v29  ;;  %v2169_v28 = vld [vmem:[%s2256_s22 + $0x330] sm:$0xff]   ;;  %v2171_v29 = vld [vmem:[%s2256_s22 + $0x378] sm:$0xff]  }
  0x5f   : > { %1968 = vmatprep.subr.bf16.mxu1 %v2120_v30  ;;  %v2170_v30 = vld [vmem:[%s2256_s22 + $0x3b0] sm:$0xff]  }
  0x61   : > { %1947 = vmatpush3.bf16.msra.mxu0 %v2121_v31  ;;  %v2172_v31 = vld [vmem:[%s2256_s22 + $0x3f8] sm:$0xff]  }
  0x62   : > { %1948 = vmatprep.subr.bf16.mxu0 %v2123_v32  ;;  %1969 = vmatpush3.bf16.msra.mxu1 %v2122_v33  ;;  %v2173_v32 = vld [vmem:[%s2256_s22 + $0x338] sm:$0xff]   ;;  %v532_v33 = vrot.slane %v2370_v53, %v2297_v42 }
  0x63   : > { %1970 = vmatprep.subr.bf16.mxu1 %v2124_v34  ;;  %v2174_v34 = vld [vmem:[%s2256_s22 + $0x3b8] sm:$0xff]  }
  0x65   : > { %1949 = vmatpush3.bf16.msra.mxu0 %v2125_v35  ;;  %v548_v35 = vcombine.high %v532_v33, %v532_v33 }
  0x66   : > { %1950 = vmatprep.subr.bf16.mxu0 %v2127_v36  ;;  %1971 = vmatpush3.bf16.msra.mxu1 %v2126_v37 }
  0x67   : > { %1972 = vmatprep.subr.bf16.mxu1 %v2128_v38 }
  0x69   : > { %1951 = vmatpush3.bf16.msra.mxu0 %v2129_v39 }
  0x6a   : > { %1952 = vmatprep.subr.bf16.mxu0 %v2131_v40  ;;  %1973 = vmatpush3.bf16.msra.mxu1 %v2130_v41 }
  0x6b   : > { %1974 = vmatprep.subr.bf16.mxu1 %v2132_v43 }
  0x6d   : > { %1953 = vmatpush3.bf16.msra.mxu0 %v2133_v44 }
  0x6e   : > { %1954 = vmatprep.subr.bf16.mxu0 %v2135_v45  ;;  %1975 = vmatpush3.bf16.msra.mxu1 %v2134_v47 }
  0x6f   : > { %1976 = vmatprep.subr.bf16.mxu1 %v2136_v50 }
  0x71   : > { %1955 = vmatpush3.bf16.msra.mxu0 %v2137_v51 }
  0x72   : > { %1956 = vmatprep.subr.bf16.mxu0 %v2139_v54  ;;  %1977 = vmatpush3.bf16.msra.mxu1 %v2138_v55 }
  0x73   : > { %1978 = vmatprep.subr.bf16.mxu1 %v2140_v58 }
  0x75   : > { %1957 = vmatpush3.bf16.msra.mxu0 %v2141_v59 }
  0x76   : > { %1986 = vmatprep.subr.bf16.mxu0 %v2143_v62  ;;  %1979 = vmatpush3.bf16.msra.mxu1 %v2142_v63 }
  0x77   : > { %2008 = vmatprep.subr.bf16.mxu1 %v2144_v1 }
  0x78   : > { %1528 = vmatmul.mubr.bf16.vlgmr.msra.gmra.mrb[8].mxu0 %v525_v61 }
  0x79   : > { %1987 = vmatpush3.bf16.msra.mxu0 %v2145_v2  ;;  %1607 = vmatprep.mubr.bf16.mxu0 %v546_v0 }
  0x7a   : > { %1568 = vmatmul.mubr.bf16.vlgmr.msra.gmra.mrb[8].mxu1 %v547_v3  ;;  %1988 = vmatprep.subr.bf16.mxu0 %v2147_v4 }
  0x7b   : > { %2009 = vmatpush3.bf16.msra.mxu1 %v2146_v5  ;;  %1647 = vmatprep.mubr.bf16.mxu1 %v550_v6 }
  0x7c   : > { %2010 = vmatprep.subr.bf16.mxu1 %v2148_v7 }
  0x7d   : > { %1989 = vmatpush3.bf16.msra.mxu0 %v2149_v8 }
  0x7e   : > { %1990 = vmatprep.subr.bf16.mxu0 %v2151_v9 }
  0x7f   : > { %2011 = vmatpush3.bf16.msra.mxu1 %v2150_v10 }
  0x80   : > { %2012 = vmatprep.subr.bf16.mxu1 %v2152_v11 }
  0x81   : > { %1991 = vmatpush3.bf16.msra.mxu0 %v2153_v12 }
  0x82   : > { %1992 = vmatprep.subr.bf16.mxu0 %v2155_v13 }
  0x83   : > { %2013 = vmatpush3.bf16.msra.mxu1 %v2154_v14 }
  0x84   : > { %2014 = vmatprep.subr.bf16.mxu1 %v2156_v15 }
  0x85   : > { %1993 = vmatpush3.bf16.msra.mxu0 %v2157_v16 }
  0x86   : > { %1994 = vmatprep.subr.bf16.mxu0 %v2159_v17 }
  0x87   : > { %2015 = vmatpush3.bf16.msra.mxu1 %v2158_v18  ;;  %v192_v18 = vld [vmem:[#allocation2] sm:$0x3] }
  0x88   : > { %2016 = vmatprep.subr.bf16.mxu1 %v2160_v19 }
  0x89   : > { %1995 = vmatpush3.bf16.msra.mxu0 %v2161_v20 }
  0x8a   : > { %1996 = vmatprep.subr.bf16.mxu0 %v2163_v21 }
  0x8b   : > { %2017 = vmatpush3.bf16.msra.mxu1 %v2162_v22 }
  0x8c   : > { %2018 = vmatprep.subr.bf16.mxu1 %v2164_v23 }
  0x8d   : > { %1997 = vmatpush3.bf16.msra.mxu0 %v2165_v24 }
  0x8e   : > { %1998 = vmatprep.subr.bf16.mxu0 %v2167_v25 }
  0x8f   : > { %2019 = vmatpush3.bf16.msra.mxu1 %v2166_v26 }
  0x90   : > { %2020 = vmatprep.subr.bf16.mxu1 %v2168_v27 }
  0x91   : > { %1999 = vmatpush3.bf16.msra.mxu0 %v2169_v28 }
  0x92   : > { %2000 = vmatprep.subr.bf16.mxu0 %v2171_v29 }
  0x93   : > { %2021 = vmatpush3.bf16.msra.mxu1 %v2170_v30 }
  0x94   : > { %2022 = vmatprep.subr.bf16.mxu1 %v2172_v31 }
  0x95   : > { %2001 = vmatpush3.bf16.msra.mxu0 %v2173_v32 }
  0x97   : > { %2023 = vmatpush3.bf16.msra.mxu1 %v2174_v34 }
  0x98   : > { %1608 = vmatmul.mubr.bf16.vlgmr.msra.gmra.mrb[12].mxu0 %v532_v33 }
  0x9a   : > { %1648 = vmatmul.mubr.bf16.vlgmr.msra.gmra.mrb[12].mxu1 %v548_v35 }
 0x10b   : > { %v1870_v36 = vpop.f32.mrb[0].mxu0 }
 0x10c   : > { %v1871_v37 = vpop.f32.mrb[1].mxu0  ;;  %v1892_v38 = vpop.f32.mrb[0].mxu1 }
 0x10d   : > { %v1872_v39 = vadd.f32 %v1871_v37, %v1870_v36  ;;  %v1873_v40 = vpop.f32.mrb[2].mxu0  ;;  %v1893_v41 = vpop.f32.mrb[1].mxu1 }
 0x10e   : > { %v1874_v43 = vpop.f32.mrb[3].mxu0  ;;  %v1894_v44 = vadd.f32 %v1893_v41, %v1892_v38  ;;  %v1895_v45 = vpop.f32.mrb[2].mxu1 }
 0x10f   : > { %v1896_v46 = vpop.f32.mrb[3].mxu1 }
 0x110   : > { %v1410_v47 = vadd.f32 %v1894_v44, %v1872_v39 }
 0x12b   : > { %v1914_v42 = vpop.f32.mrb[4].mxu0 }
 0x12c   : > { %v1915_v48 = vpop.f32.mrb[5].mxu0  ;;  %v1936_v49 = vpop.f32.mrb[4].mxu1 }
 0x12d   : > { %v1916_v50 = vadd.f32 %v1915_v48, %v1914_v42  ;;  %v1917_v51 = vpop.f32.mrb[6].mxu0  ;;  %v1937_v52 = vpop.f32.mrb[5].mxu1 }
 0x12e   : > { %v1918_v53 = vpop.f32.mrb[7].mxu0  ;;  %v1938_v55 = vadd.f32 %v1937_v52, %v1936_v49  ;;  %v1939_v56 = vpop.f32.mrb[6].mxu1 }
 0x12f   : > { %v1450_v54 = vadd.f32 %v1916_v50, %v1410_v47  ;;  %v1940_v57 = vpop.f32.mrb[7].mxu1 }
 0x131   : > { %v1490_v58 = vadd.f32 %v1938_v55, %v1450_v54 }
 0x14b   : > { %v1958_v59 = vpop.f32.mrb[8].mxu0 }
 0x14c   : > { %v1959_v60 = vpop.f32.mrb[9].mxu0 }
 0x14d   : > { %v1980_v61 = vpop.f32.mrb[8].mxu1  ;;  %v1960_v62 = vadd.f32 %v1959_v60, %v1958_v59  ;;  %v1961_v63 = vpop.f32.mrb[10].mxu0 }
 0x14e   : > { %v1981_v0 = vpop.f32.mrb[9].mxu1  ;;  %v1962_v1 = vpop.f32.mrb[11].mxu0 }
 0x14f   : > { %v1530_v2 = vadd.f32 %v1960_v62, %v1490_v58  ;;  %v1982_v3 = vadd.f32 %v1981_v0, %v1980_v61  ;;  %v1983_v4 = vpop.f32.mrb[10].mxu1 }
 0x150   : > { %v1984_v5 = vpop.f32.mrb[11].mxu1 }
 0x151   : > { %v1570_v6 = vadd.f32 %v1982_v3, %v1530_v2 }
 0x16b   : > { %v2002_v7 = vpop.f32.mrb[12].mxu0 }
 0x16c   : > { %v2003_v8 = vpop.f32.mrb[13].mxu0 }
 0x16d   : > { %v2024_v9 = vpop.f32.mrb[12].mxu1  ;;  %v2004_v10 = vadd.f32 %v2003_v8, %v2002_v7  ;;  %v2005_v11 = vpop.f32.mrb[14].mxu0 }
 0x16e   : > { %v2025_v12 = vpop.f32.mrb[13].mxu1  ;;  %v2006_v13 = vpop.f32.mrb[15].mxu0 }
 0x16f   : > { %v1610_v14 = vadd.f32 %v2004_v10, %v1570_v6  ;;  %v2026_v15 = vadd.f32 %v2025_v12, %v2024_v9  ;;  %v2027_v16 = vpop.f32.mrb[14].mxu1 }
 0x170   : > { %v2028_v17 = vpop.f32.mrb[15].mxu1 }
 0x171   : > { %v1650_v19 = vadd.f32 %v2026_v15, %v1610_v14 }
 0x173   : > { %v1655_v20 = vadd.f32 %v1650_v19, %v192_v18 }
 0x175   : > { %1657 = vst.msk [vmem:[#allocation2] sm:$0x3] %vm1656_vm1, %v1655_v20 }
 0x176   : > { %2189 = shalt.err (!%p2186_p13)
}
 0x177   : > { %s2190_s30 = scalar_lea.hbm %s2445_s3, 32 }
 0x178   : > { %p2191_p0 = scmp.ne.s32.totalorder %s2445_s3, %s2190_s30  ;;  %p2196_p3 = scmp.lt.u32.totalorder %s2190_s30, %s2445_s3 }
 0x17a   : > { %p2192_p1 = pnand %p2191_p0, %p2034_p6 }
 0x17c   : > { %p2193_p2 = pneg %p2192_p1 }
 0x17e   : > { %p2198_p4 = pnand %p2196_p3, %p2193_p2 }
 0x180   : > { %2201 = shalt.err (!%p2198_p4)
}
 0x181   : > { %2031 = dma.vmem_to_hbm [thread:$0]  (%p2034_p6), %s1666_s26, 32, %s2445_s3, [#allocation3]  }
 0x182   : > { %2207 = dma.done.wait (%p2034_p6), [#allocation3], 32  }
 0x183   : > { %2209 = vsyncadd (%p2034_p6), [#allocation3], 4294967264 }
 0x184 PF: > { %s14_s12 = sadd.s32 1, %s2212_s12  }
 0x185   : > { %p11_p5 = scmp.ge.s32.totalorder %s14_s12, 10  }
 0x187   :  { %13 = sbr.rel (!%p11_p5) target bundleno = 1 (0x1), region = 66 }
 0x18e   :  { %1678 = vsyncpa [#allocation3], 1 }
 0x18f   :  { %1680 = vsyncpa [#allocation3 + $0x1], 1 }

</bundles_post_ra>
